<compile_context>
chip_gen: v6e
topology: v6e:2x2x1
jax: 0.10.0
libtpu: 0.0.40
codegen_flags: <defaults>
</compile_context>

<pallas_src>
import math

import jax
import jax.numpy as jnp
from jax import lax
from jax.experimental import pallas as pl
from jax.experimental.pallas import tpu as pltpu

_INV_SQRT2 = 0.7071067811865476

# Abramowitz & Stegun 7.1.26 erfc coefficients (|erf(x) error| <= 1.5e-7 for all x >= 0).
_AS_P = 0.3275911
_AS_A1 = 0.254829592
_AS_A2 = -0.284496736
_AS_A3 = 1.421413741
_AS_A4 = -1.453152027
_AS_A5 = 1.061405429


def _gelu_exact(x):
    """PyTorch nn.GELU() (exact-erf) to ~2e-7 absolute error.

    erf is evaluated via the A&S 7.1.26 erfc formula so the transcendentals
    (exp, reciprocal) run on the EUP slot instead of the saturated VALU slot,
    and the odd-symmetry sign fix folds into the final GELU select:
        1 + erf(x/sqrt(2)) = 2 - erfc(|z|)  for x >= 0,   erfc(|z|)  for x < 0.
    """
    z = x * _INV_SQRT2
    az = jnp.abs(z)
    t = pl.reciprocal(1.0 + _AS_P * az, approx=False)                 # EUP
    poly = ((((_AS_A5 * t + _AS_A4) * t + _AS_A3) * t + _AS_A2) * t + _AS_A1) * t
    erfc_abs = poly * jnp.exp(-(az * az))                             # exp on EUP
    return 0.5 * x * jnp.where(x >= 0, 2.0 - erfc_abs, erfc_abs)


def mlp_kernel(x_ref, w1_ref, b1_ref, w2_ref, b2_ref, w3_ref, b3_ref, o_ref):
    # Transposed, lane-dense layout: x_ref is [8, TB] (batch on the 128-lane axis),
    # weights are W^T, biases are [out, 1] columns broadcasting along lanes.
    h = jnp.dot(w1_ref[...], x_ref[...], preferred_element_type=jnp.float32,
                precision=lax.Precision.HIGHEST) + b1_ref[...]
    h = _gelu_exact(h)                                                # [64, TB]
    h = jnp.dot(w2_ref[...], h, preferred_element_type=jnp.float32,
                precision=lax.Precision.HIGHEST) + b2_ref[...]
    h = _gelu_exact(h)                                                # [32, TB]
    o_ref[...] = (jnp.dot(w3_ref[...], h, preferred_element_type=jnp.float32,
                          precision=lax.Precision.HIGHEST)
                  + b3_ref[...]).astype(o_ref.dtype)                  # [4, TB], full-lane store


def mlp_forward(x, params, *, tb=8192):
    """Full MLP forward pass as a single batch-gridded Pallas kernel.

    x: [B, 8] float32
    params: w1 (8,64), b1 (64,), w2 (64,32), b2 (32,), w3 (32,4), b3 (4,)
            (weights stored (in, out)-major, so y = x @ W + b == PyTorch x @ weight.T + bias)
    returns: [B, 4] float32

    The kernel runs in a feature-major layout ([features, batch]); only cheap transposes
    happen in the wrapper (no pad/copy). If this MLP sits inside a larger feature-major
    pipeline, feed/consume [8, B] / [4, B] directly and both transposes disappear.
    """
    B, f_in = x.shape
    f_out = params["w3"].shape[1]

    lane = 128
    tb = max(lane, (int(tb) // lane) * lane)            # lane dim must stay 128-aligned
    b_lane = pl.cdiv(B, lane) * lane
    if b_lane >= 2 * lane:
        # Keep >= 2 grid steps so the "parallel" axis shards across both v7x TensorCores.
        TB = min(tb, pl.cdiv(pl.cdiv(b_lane, 2), lane) * lane)
    else:
        TB = lane
    grid = (pl.cdiv(B, TB),)

    # No zero-pad materialization: Pallas masks the ragged last block. Pad columns may
    # hold garbage, but every op is column-independent and pad columns are never
    # written back to the [f_out, B] output.
    xT = x.T.astype(jnp.float32)                        # [8, B], batch on the lane axis

    w1T = params["w1"].T                                # [64, 8]
    w2T = params["w2"].T                                # [32, 64]
    w3T = params["w3"].T                                # [4, 32]
    b1 = params["b1"].reshape(-1, 1)                    # [64, 1]
    b2 = params["b2"].reshape(-1, 1)                    # [32, 1]
    b3 = params["b3"].reshape(-1, 1)                    # [4, 1]

    def resident(arr):
        # Same block every grid step -> weight/bias stays resident in VMEM (no re-DMA).
        return pl.BlockSpec(arr.shape, lambda i: (0, 0))

    outT = pl.pallas_call(
        mlp_kernel,
        out_shape=jax.ShapeDtypeStruct((f_out, B), jnp.float32),
        grid=grid,
        in_specs=[
            pl.BlockSpec((f_in, TB), lambda i: (0, i)),   # streamed, double-buffered x tiles
            resident(w1T), resident(b1),
            resident(w2T), resident(b2),
            resident(w3T), resident(b3),
        ],
        out_specs=pl.BlockSpec((f_out, TB), lambda i: (0, i)),
        compiler_params=pltpu.CompilerParams(
            dimension_semantics=("parallel",),            # megacore split on v7x
        ),
    )(xT, w1T, b1, w2T, b2, w3T, b3)

    return outT.T                                         # [B, 4]


def init_params(key, layers=(8, 64, 32, 4)):
    """Deterministic init mimicking nn.Linear's uniform(-1/sqrt(fan_in), 1/sqrt(fan_in))."""
    params = {}
    keys = jax.random.split(key, 2 * (len(layers) - 1))
    for i in range(len(layers) - 1):
        fan_in, fan_out = layers[i], layers[i + 1]
        bound = 1.0 / math.sqrt(fan_in)
        params[f"w{i + 1}"] = jax.random.uniform(
            keys[2 * i], (fan_in, fan_out), minval=-bound, maxval=bound, dtype=jnp.float32)
        params[f"b{i + 1}"] = jax.random.uniform(
            keys[2 * i + 1], (fan_out,), minval=-bound, maxval=bound, dtype=jnp.float32)
    return params


def reference_forward(x, params):
    """Pure-JAX reference matching PyTorch semantics (exact GELU via lax.erf)."""
    h = x @ params["w1"] + params["b1"]
    h = jax.nn.gelu(h, approximate=False)
    h = h @ params["w2"] + params["b2"]
    h = jax.nn.gelu(h, approximate=False)
    return h @ params["w3"] + params["b3"]


if __name__ == "__main__":
    key = jax.random.PRNGKey(0)
    k_params, k_x1, k_x2 = jax.random.split(key, 3)

    layers = (8, 64, 32, 4)
    params = init_params(k_params, layers)

    # Small batch: single (padded) 128-lane tile, one grid step.
    x_small = jax.random.normal(k_x1, (4, layers[0]), dtype=jnp.float32)
    out_small = jax.block_until_ready(mlp_forward(x_small, params))
    ref_small = reference_forward(x_small, params)
    assert out_small.shape == (4, layers[-1])
    assert jnp.allclose(out_small, ref_small, atol=1e-5, rtol=1e-5), "small-batch mismatch"

    # Ragged batch, default tb: TB=256 -> 2 grid steps (both v7x cores), masked tail block.
    x_multi = jax.random.normal(k_x2, (260, layers[0]), dtype=jnp.float32)
    out_multi = jax.block_until_ready(mlp_forward(x_multi, params))
    ref_multi = reference_forward(x_multi, params)
    assert out_multi.shape == (260, layers[-1])
    assert jnp.allclose(out_multi, ref_multi, atol=1e-5, rtol=1e-5), "multi-tile mismatch"

    # Non-128-multiple tb exercises the clamp path (tb=200 -> 128 -> 3 grid steps).
    out_multi_small = jax.block_until_ready(mlp_forward(x_multi, params, tb=200))
    assert jnp.allclose(out_multi_small, ref_multi, atol=1e-5, rtol=1e-5), "clamped-tb mismatch"

    print("KERNEL_OK")
</pallas_src>

<mosaic_0001>
module attributes {stable_mosaic.version = 11 : i64} {
  func.func @mlp_kernel(%arg0: i32, %arg1: memref<8x128xf32, #tpu.memory_space<vmem>>, %arg2: memref<64x8xf32, #tpu.memory_space<vmem>>, %arg3: memref<64x1xf32, #tpu.memory_space<vmem>>, %arg4: memref<32x64xf32, #tpu.memory_space<vmem>>, %arg5: memref<32x1xf32, #tpu.memory_space<vmem>>, %arg6: memref<4x32xf32, #tpu.memory_space<vmem>>, %arg7: memref<4x1xf32, #tpu.memory_space<vmem>>, %arg8: memref<4x128xf32, #tpu.memory_space<vmem>>) attributes {dimension_semantics = [#tpu.dimension_semantics<parallel>], iteration_bounds = array<i64: 1>, scalar_prefetch = 0 : i64, scratch_operands = 0 : i64, tpu.core_type = #tpu.core_type<tc>, window_params = [{transform_indices = @transform_0, window_bounds = array<i64: 8, 128>}, {pipeline_mode = #tpu.pipeline_mode<synchronous>, transform_indices = @transform_1, window_bounds = array<i64: 64, 8>}, {pipeline_mode = #tpu.pipeline_mode<synchronous>, transform_indices = @transform_2, window_bounds = array<i64: 64, 1>}, {pipeline_mode = #tpu.pipeline_mode<synchronous>, transform_indices = @transform_3, window_bounds = array<i64: 32, 64>}, {pipeline_mode = #tpu.pipeline_mode<synchronous>, transform_indices = @transform_4, window_bounds = array<i64: 32, 1>}, {pipeline_mode = #tpu.pipeline_mode<synchronous>, transform_indices = @transform_5, window_bounds = array<i64: 4, 32>}, {pipeline_mode = #tpu.pipeline_mode<synchronous>, transform_indices = @transform_6, window_bounds = array<i64: 4, 1>}, {transform_indices = @transform_7, window_bounds = array<i64: 4, 128>}]} {
    %c0 = arith.constant 0 : index
    %c0_0 = arith.constant 0 : index
    %0 = vector.load %arg2[%c0, %c0_0] : memref<64x8xf32, #tpu.memory_space<vmem>>, vector<64x8xf32>
    %c0_1 = arith.constant 0 : index
    %c0_2 = arith.constant 0 : index
    %1 = vector.load %arg1[%c0_1, %c0_2] : memref<8x128xf32, #tpu.memory_space<vmem>>, vector<8x128xf32>
    %cst = arith.constant dense<0.000000e+00> : vector<64x128xf32>
    %2 = tpu.matmul %0, %1, %cst {dimension_numbers = #tpu.dot_dimension_numbers<[1], [0], [0], [1], [0, 0, 1, 1], [], []>, precision = #tpu.contract_precision<fp32>} : vector<64x8xf32>, vector<8x128xf32>, vector<64x128xf32> -> vector<64x128xf32>
    %c0_3 = arith.constant 0 : index
    %c0_4 = arith.constant 0 : index
    %3 = vector.load %arg3[%c0_3, %c0_4] : memref<64x1xf32, #tpu.memory_space<vmem>>, vector<64x1xf32>
    %4 = vector.broadcast %3 : vector<64x1xf32> to vector<64x128xf32>
    %5 = arith.addf %2, %4 : vector<64x128xf32>
    %cst_5 = arith.constant 0.707106769 : f32
    %6 = vector.broadcast %cst_5 : f32 to vector<64x128xf32>
    %7 = arith.mulf %5, %6 : vector<64x128xf32>
    %8 = math.absf %7 : vector<64x128xf32>
    %cst_6 = arith.constant 0.327591091 : f32
    %9 = vector.broadcast %cst_6 : f32 to vector<64x128xf32>
    %10 = arith.mulf %9, %8 : vector<64x128xf32>
    %cst_7 = arith.constant 1.000000e+00 : f32
    %11 = vector.broadcast %cst_7 : f32 to vector<64x128xf32>
    %12 = arith.addf %11, %10 : vector<64x128xf32>
    %13 = tpu.reciprocal %12 : vector<64x128xf32> -> vector<64x128xf32>
    %cst_8 = arith.constant 1.06140542 : f32
    %14 = vector.broadcast %cst_8 : f32 to vector<64x128xf32>
    %15 = arith.mulf %14, %13 : vector<64x128xf32>
    %cst_9 = arith.constant -1.45315206 : f32
    %16 = vector.broadcast %cst_9 : f32 to vector<64x128xf32>
    %17 = arith.addf %15, %16 : vector<64x128xf32>
    %18 = arith.mulf %17, %13 : vector<64x128xf32>
    %cst_10 = arith.constant 1.42141378 : f32
    %19 = vector.broadcast %cst_10 : f32 to vector<64x128xf32>
    %20 = arith.addf %18, %19 : vector<64x128xf32>
    %21 = arith.mulf %20, %13 : vector<64x128xf32>
    %cst_11 = arith.constant -0.284496725 : f32
    %22 = vector.broadcast %cst_11 : f32 to vector<64x128xf32>
    %23 = arith.addf %21, %22 : vector<64x128xf32>
    %24 = arith.mulf %23, %13 : vector<64x128xf32>
    %cst_12 = arith.constant 0.254829586 : f32
    %25 = vector.broadcast %cst_12 : f32 to vector<64x128xf32>
    %26 = arith.addf %24, %25 : vector<64x128xf32>
    %27 = arith.mulf %26, %13 : vector<64x128xf32>
    %28 = arith.mulf %8, %8 : vector<64x128xf32>
    %cst_13 = arith.constant 0.000000e+00 : f32
    %29 = vector.broadcast %cst_13 : f32 to vector<64x128xf32>
    %30 = arith.subf %29, %28 : vector<64x128xf32>
    %31 = math.exp %30 : vector<64x128xf32>
    %32 = arith.mulf %27, %31 : vector<64x128xf32>
    %cst_14 = arith.constant 5.000000e-01 : f32
    %33 = vector.broadcast %cst_14 : f32 to vector<64x128xf32>
    %34 = arith.mulf %33, %5 : vector<64x128xf32>
    %cst_15 = arith.constant 0.000000e+00 : f32
    %35 = vector.broadcast %cst_15 : f32 to vector<64x128xf32>
    %36 = arith.cmpf oge, %5, %35 : vector<64x128xf32>
    %cst_16 = arith.constant 2.000000e+00 : f32
    %37 = vector.broadcast %cst_16 : f32 to vector<64x128xf32>
    %38 = arith.subf %37, %32 : vector<64x128xf32>
    %39 = arith.select %36, %38, %32 : vector<64x128xi1>, vector<64x128xf32>
    %40 = arith.mulf %34, %39 : vector<64x128xf32>
    %c0_17 = arith.constant 0 : index
    %c0_18 = arith.constant 0 : index
    %41 = vector.load %arg4[%c0_17, %c0_18] : memref<32x64xf32, #tpu.memory_space<vmem>>, vector<32x64xf32>
    %cst_19 = arith.constant dense<0.000000e+00> : vector<32x128xf32>
    %42 = tpu.matmul %41, %40, %cst_19 {dimension_numbers = #tpu.dot_dimension_numbers<[1], [0], [0], [1], [0, 0, 1, 1], [], []>, precision = #tpu.contract_precision<fp32>} : vector<32x64xf32>, vector<64x128xf32>, vector<32x128xf32> -> vector<32x128xf32>
    %c0_20 = arith.constant 0 : index
    %c0_21 = arith.constant 0 : index
    %43 = vector.load %arg5[%c0_20, %c0_21] : memref<32x1xf32, #tpu.memory_space<vmem>>, vector<32x1xf32>
    %44 = vector.broadcast %43 : vector<32x1xf32> to vector<32x128xf32>
    %45 = arith.addf %42, %44 : vector<32x128xf32>
    %cst_22 = arith.constant 0.707106769 : f32
    %46 = vector.broadcast %cst_22 : f32 to vector<32x128xf32>
    %47 = arith.mulf %45, %46 : vector<32x128xf32>
    %48 = math.absf %47 : vector<32x128xf32>
    %cst_23 = arith.constant 0.327591091 : f32
    %49 = vector.broadcast %cst_23 : f32 to vector<32x128xf32>
    %50 = arith.mulf %49, %48 : vector<32x128xf32>
    %cst_24 = arith.constant 1.000000e+00 : f32
    %51 = vector.broadcast %cst_24 : f32 to vector<32x128xf32>
    %52 = arith.addf %51, %50 : vector<32x128xf32>
    %53 = tpu.reciprocal %52 : vector<32x128xf32> -> vector<32x128xf32>
    %cst_25 = arith.constant 1.06140542 : f32
    %54 = vector.broadcast %cst_25 : f32 to vector<32x128xf32>
    %55 = arith.mulf %54, %53 : vector<32x128xf32>
    %cst_26 = arith.constant -1.45315206 : f32
    %56 = vector.broadcast %cst_26 : f32 to vector<32x128xf32>
    %57 = arith.addf %55, %56 : vector<32x128xf32>
    %58 = arith.mulf %57, %53 : vector<32x128xf32>
    %cst_27 = arith.constant 1.42141378 : f32
    %59 = vector.broadcast %cst_27 : f32 to vector<32x128xf32>
    %60 = arith.addf %58, %59 : vector<32x128xf32>
    %61 = arith.mulf %60, %53 : vector<32x128xf32>
    %cst_28 = arith.constant -0.284496725 : f32
    %62 = vector.broadcast %cst_28 : f32 to vector<32x128xf32>
    %63 = arith.addf %61, %62 : vector<32x128xf32>
    %64 = arith.mulf %63, %53 : vector<32x128xf32>
    %cst_29 = arith.constant 0.254829586 : f32
    %65 = vector.broadcast %cst_29 : f32 to vector<32x128xf32>
    %66 = arith.addf %64, %65 : vector<32x128xf32>
    %67 = arith.mulf %66, %53 : vector<32x128xf32>
    %68 = arith.mulf %48, %48 : vector<32x128xf32>
    %cst_30 = arith.constant 0.000000e+00 : f32
    %69 = vector.broadcast %cst_30 : f32 to vector<32x128xf32>
    %70 = arith.subf %69, %68 : vector<32x128xf32>
    %71 = math.exp %70 : vector<32x128xf32>
    %72 = arith.mulf %67, %71 : vector<32x128xf32>
    %cst_31 = arith.constant 5.000000e-01 : f32
    %73 = vector.broadcast %cst_31 : f32 to vector<32x128xf32>
    %74 = arith.mulf %73, %45 : vector<32x128xf32>
    %cst_32 = arith.constant 0.000000e+00 : f32
    %75 = vector.broadcast %cst_32 : f32 to vector<32x128xf32>
    %76 = arith.cmpf oge, %45, %75 : vector<32x128xf32>
    %cst_33 = arith.constant 2.000000e+00 : f32
    %77 = vector.broadcast %cst_33 : f32 to vector<32x128xf32>
    %78 = arith.subf %77, %72 : vector<32x128xf32>
    %79 = arith.select %76, %78, %72 : vector<32x128xi1>, vector<32x128xf32>
    %80 = arith.mulf %74, %79 : vector<32x128xf32>
    %c0_34 = arith.constant 0 : index
    %c0_35 = arith.constant 0 : index
    %81 = vector.load %arg6[%c0_34, %c0_35] : memref<4x32xf32, #tpu.memory_space<vmem>>, vector<4x32xf32>
    %cst_36 = arith.constant dense<0.000000e+00> : vector<4x128xf32>
    %82 = tpu.matmul %81, %80, %cst_36 {dimension_numbers = #tpu.dot_dimension_numbers<[1], [0], [0], [1], [0, 0, 1, 1], [], []>, precision = #tpu.contract_precision<fp32>} : vector<4x32xf32>, vector<32x128xf32>, vector<4x128xf32> -> vector<4x128xf32>
    %c0_37 = arith.constant 0 : index
    %c0_38 = arith.constant 0 : index
    %83 = vector.load %arg7[%c0_37, %c0_38] : memref<4x1xf32, #tpu.memory_space<vmem>>, vector<4x1xf32>
    %84 = vector.broadcast %83 : vector<4x1xf32> to vector<4x128xf32>
    %85 = arith.addf %82, %84 : vector<4x128xf32>
    %c0_39 = arith.constant 0 : index
    %c0_40 = arith.constant 0 : index
    %86 = vector.load %arg8[%c0_39, %c0_40] : memref<4x128xf32, #tpu.memory_space<vmem>>, vector<4x128xf32>
    tpu.vector_store %arg8[%c0_39, %c0_40], %85 {strides = array<i32>} : memref<4x128xf32, #tpu.memory_space<vmem>>, vector<4x128xf32>,
    return
  }
  func.func @transform_0(%arg0: i32) -> (i32, i32) {
    %c0_i32 = arith.constant 0 : i32
    %c0_i32_0 = arith.constant 0 : i32
    return %c0_i32, %arg0 : i32, i32
  }
  func.func @transform_1(%arg0: i32) -> (i32, i32) {
    %c0_i32 = arith.constant 0 : i32
    %c0_i32_0 = arith.constant 0 : i32
    %c0_i32_1 = arith.constant 0 : i32
    return %c0_i32, %c0_i32_0 : i32, i32
  }
  func.func @transform_2(%arg0: i32) -> (i32, i32) {
    %c0_i32 = arith.constant 0 : i32
    %c0_i32_0 = arith.constant 0 : i32
    %c0_i32_1 = arith.constant 0 : i32
    return %c0_i32, %c0_i32_0 : i32, i32
  }
  func.func @transform_3(%arg0: i32) -> (i32, i32) {
    %c0_i32 = arith.constant 0 : i32
    %c0_i32_0 = arith.constant 0 : i32
    %c0_i32_1 = arith.constant 0 : i32
    return %c0_i32, %c0_i32_0 : i32, i32
  }
  func.func @transform_4(%arg0: i32) -> (i32, i32) {
    %c0_i32 = arith.constant 0 : i32
    %c0_i32_0 = arith.constant 0 : i32
    %c0_i32_1 = arith.constant 0 : i32
    return %c0_i32, %c0_i32_0 : i32, i32
  }
  func.func @transform_5(%arg0: i32) -> (i32, i32) {
    %c0_i32 = arith.constant 0 : i32
    %c0_i32_0 = arith.constant 0 : i32
    %c0_i32_1 = arith.constant 0 : i32
    return %c0_i32, %c0_i32_0 : i32, i32
  }
  func.func @transform_6(%arg0: i32) -> (i32, i32) {
    %c0_i32 = arith.constant 0 : i32
    %c0_i32_0 = arith.constant 0 : i32
    %c0_i32_1 = arith.constant 0 : i32
    return %c0_i32, %c0_i32_0 : i32, i32
  }
  func.func @transform_7(%arg0: i32) -> (i32, i32) {
    %c0_i32 = arith.constant 0 : i32
    %c0_i32_0 = arith.constant 0 : i32
    return %c0_i32, %arg0 : i32, i32
  }
}

</mosaic_0001>

<bundles_post_ra>
// kernel: tpu_custom_call.1
= control target key start
LH: loop header
LB: loop body
LE: loop exit
PB: predicated region body
PF: predicated region fallthrough
CT: control target
= control target key end

     0   :  { %vm84_vm0 = vcmask 64512   ;;  %v2876_v9 = vmov 0   ;;  %s3571_s0 = inlined_call_operand.vmem [shape: f32[8,4], index: 0, kind: input, shape index: {}]   ;;  %s3572_s1 = inlined_call_operand.vmem [shape: f32[64,8], index: 1, kind: input, shape index: {}]   ;;  %s3573_s2 = inlined_call_operand.vmem [shape: f32[64,1], index: 2, kind: input, shape index: {}]   ;;  %s3574_s3 = inlined_call_operand.vmem [shape: f32[32,64], index: 3, kind: input, shape index: {}]   ;;  %s3575_s4 = inlined_call_operand.vmem [shape: f32[32,1], index: 4, kind: input, shape index: {}]   ;;  %s3576_s5 = inlined_call_operand.vmem [shape: f32[4,32], index: 5, kind: input, shape index: {}]   ;;  %s3577_s6 = inlined_call_operand.vmem [shape: f32[4,1], index: 6, kind: input, shape index: {}]   ;;  %s3578_s7 = inlined_call_operand.hbm [shape: f32[4,4], index: 7, kind: output, shape index: {}]  }
   0x1   :  { %v35_v0 = vld [vmem:[%s3571_s0] sm:$0xff]  ;;  %v28_v2 = vld [vmem:[%s3572_s1 + $0x8] sm:$0xff]  ;;  %v29_v6 = vld [vmem:[%s3572_s1 + $0x10] sm:$0xff]  ;;  %2804 = vset.pattern.permute.xlu0 %v2876_v9  ;;  %2805 = vset.pattern.permute.xlu1 %v2876_v9 }
   0x2   :  { %v27_v1 = vld [vmem:[%s3572_s1] sm:$0xff]  ;;  %v2929_v3 = vand.u32 4294901760, %v35_v0  ;;  %v89_v5 = vsel %vm84_vm0, %v28_v2, 0  ;;  %v30_v7 = vld [vmem:[%s3572_s1 + $0x18] sm:$0xff]  ;;  %v92_v12 = vsel %vm84_vm0, %v29_v6, 0  ;;  %v32_v14 = vld [vmem:[%s3572_s1 + $0x28] sm:$0xff] }
   0x3   :  { %v86_v4 = vsel %vm84_vm0, %v27_v1, 0  ;;  %v31_v8 = vld [vmem:[%s3572_s1 + $0x20] sm:$0xff]  ;;  %v2944_v11 = vand.u32 4294901760, %v89_v5  ;;  %v95_v13 = vsel %vm84_vm0, %v30_v7, 0  ;;  %v2953_v16 = vand.u32 4294901760, %v92_v12  ;;  %v33_v19 = vld [vmem:[%s3572_s1 + $0x30] sm:$0xff] }
   0x4   :  { %v2942_v10 = vand.u32 4294901760, %v86_v4  ;;  %2518 = vmatprep.subr.mxu0 %v2929_v3  ;;  %v287_v15 = vsub.f32 %v35_v0, %v2929_v3  ;;  %v2955_v17 = vand.u32 4294901760, %v95_v13  ;;  %v98_v18 = vsel %vm84_vm0, %v31_v8, 0  ;;  %v43_v20 = vld [vmem:[%s3573_s2 + $0x38] sm:$0xff]  ;;  %v41_v21 = vld [vmem:[%s3573_s2 + $0x28] sm:$0xff]  ;;  %v42_v34 = vld [vmem:[%s3573_s2 + $0x30] sm:$0xff] }
   0x5   :  { %2519 = vmatpush3.msra.mxu0 %v2929_v3  ;;  %v2973_v23 = vsub.f32 %v89_v5, %v2944_v11  ;;  %v2975_v24 = vand.u32 4294901760, %v98_v18  ;;  %v101_v25 = vsel %vm84_vm0, %v32_v14, 0  ;;  %v2981_v27 = vsub.f32 %v92_v12, %v2953_v16  ;;  %81 = vperm.xlu0 %2804, %v43_v20   ;;  %v40_v39 = vld [vmem:[%s3573_s2 + $0x20] sm:$0xff]  ;;  %v34_v44 = vld [vmem:[%s3572_s1 + $0x38] sm:$0xff] }
   0x6   :  { %v2969_v22 = vsub.f32 %v86_v4, %v2942_v10  ;;  %2534 = vmatprep.mubr.f32.mxu1 %v2942_v10  ;;  %v2978_v26 = vand.u32 4294901760, %v287_v15  ;;  %2546 = vmatprep.subr.mxu0 %v287_v15  ;;  %v2984_v28 = vsub.f32 %v95_v13, %v2955_v17  ;;  %v2986_v29 = vand.u32 4294901760, %v101_v25 }
   0x7   :  { %v187_v31 = vand.u32 4294901760, %v2973_v23  ;;  %v2991_v32 = vsub.f32 %v98_v18, %v2975_v24  ;;  %v104_v33 = vsel %vm84_vm0, %v33_v19, 0  ;;  %71 = vperm.xlu1 %2805, %v41_v21   ;;  %v197_v36 = vand.u32 4294901760, %v2981_v27 }
   0x8   :  { %v177_v30 = vand.u32 4294901760, %v2969_v22  ;;  %v289_v35 = vsub.f32 %v287_v15, %v2978_v26  ;;  %v207_v37 = vand.u32 4294901760, %v2984_v28  ;;  %v3001_v38 = vsub.f32 %v101_v25, %v2986_v29 }
   0x9   :  { %v188_v41 = vsub.f32 %v2973_v23, %v187_v31  ;;  %v217_v42 = vand.u32 4294901760, %v2991_v32  ;;  %v3013_v43 = vand.u32 4294901760, %v104_v33 }
   0xa   :  { %v178_v40 = vsub.f32 %v2969_v22, %v177_v30 }
   0xb   :  { %12 = vsyncpa [#allocation3], 0  ;;  %v290_v45 = vand.u32 4294901760, %v289_v35  ;;  %v198_v46 = vsub.f32 %v2981_v27, %v197_v36  ;;  %v208_v47 = vsub.f32 %v2984_v28, %v207_v37  ;;  %v227_v48 = vand.u32 4294901760, %v3001_v38  ;;  %76 = vperm.xlu0 %2804, %v42_v34   ;;  %66 = vperm.xlu1 %2805, %v40_v39   ;;  %v39_v63 = vld [vmem:[%s3573_s2 + $0x18] sm:$0xff]  ;;  %v38_v1 = vld [vmem:[%s3573_s2 + $0x10] sm:$0xff] }
   0xc   :  { %v179_v49 = vand.u32 4294901760, %v178_v40  ;;  %v189_v50 = vand.u32 4294901760, %v188_v41  ;;  %v218_v51 = vsub.f32 %v2991_v32, %v217_v42  ;;  %v3029_v52 = vsub.f32 %v104_v33, %v3013_v43  ;;  %v37_v5 = vld [vmem:[%s3573_s2 + $0x8] sm:$0xff]  ;;  %v36_v7 = vld [vmem:[%s3573_s2] sm:$0xff]  ;;  %v1055_v8 = vld [vmem:[%s3575_s4 + $0x18] sm:$0xff] }
   0xd   :  { %2532 = vmatprep.subr.mxu1 %v290_v45  ;;  %v199_v53 = vand.u32 4294901760, %v198_v46  ;;  %v107_v54 = vsel %vm84_vm0, %v34_v44, 0  ;;  %v209_v57 = vand.u32 4294901760, %v208_v47  ;;  %v228_v58 = vsub.f32 %v3001_v38, %v227_v48  ;;  %v1054_v9 = vld [vmem:[%s3575_s4 + $0x10] sm:$0xff]  ;;  %v1053_v12 = vld [vmem:[%s3575_s4 + $0x8] sm:$0xff]  ;;  %v1052_v13 = vld [vmem:[%s3575_s4] sm:$0xff] }
   0xe   :  { %2520 = vmatprep.mubr.f32.mxu0 %v179_v49  ;;  %2533 = vmatpush3.msra.mxu1 %v290_v45  ;;  %v237_v55 = vand.u32 4294901760, %v3029_v52  ;;  %v3033_v56 = vand.u32 4294901760, %v107_v54  ;;  %v219_v59 = vand.u32 4294901760, %v218_v51  ;;  %v1852_v14 = vld [vmem:[%s3577_s6] sm:$0xf]  ;;  %vm1076_vm1 = vcmask 523264  }
   0xf   :  { %2521 = vmatmul.mubr.f32.vlgmr.msra.gmra.mxu0 %v189_v50  ;;  %2535 = vmatmul.mubr.f32.vlgmr.msra.gmra.mxu1 %v2944_v11  ;;  %v229_v0 = vand.u32 4294901760, %v228_v58  ;;  %vm2878_vm10 = vmmov 0   ;;  %vm1858_vm11 = vcmask 261120  }
  0x10   :  { %2547 = vmatpush3.msra.mxu0 %v287_v15  ;;  %2560 = vmatprep.subr.mxu1 %v2929_v3  ;;  %v238_v60 = vsub.f32 %v3029_v52, %v237_v55  ;;  %v246_v61 = vsub.f32 %v107_v54, %v3033_v56 }
  0x11   :  { %2561 = vmatpush3.msra.mxu1 %v2929_v3  ;;  %2523 = vmatprep.mubr.f32.mxu0 %v199_v53 }
  0x12   :  { %2537 = vmatprep.mubr.f32.mxu1 %v2953_v16  ;;  %v247_v62 = vand.u32 4294901760, %v246_v61  ;;  %2574 = vmatprep.subr.mxu0 %v2978_v26  ;;  %v239_v2 = vand.u32 4294901760, %v238_v60 }
  0x13   :  { %2524 = vmatmul.mubr.f32.gmra.mxu0 %v209_v57  ;;  %2538 = vmatmul.mubr.f32.gmra.mxu1 %v2955_v17 }
  0x14   :  { %2526 = vmatprep.mubr.f32.mxu0 %v219_v59  ;;  %2540 = vmatprep.mubr.f32.mxu1 %v2975_v24  ;;  %v248_v4 = vsub.f32 %v246_v61, %v247_v62 }
  0x15   :  { %2588 = vmatprep.subr.mxu1 %v2929_v3  ;;  %61 = vperm.xlu0 %2804, %v39_v63  }
  0x16   :  { %56 = vperm.xlu1 %2805, %v38_v1   ;;  %v249_v6 = vand.u32 4294901760, %v248_v4 }
  0x17   :  { %2527 = vmatmul.mubr.f32.gmra.mxu0 %v229_v0  ;;  %2541 = vmatmul.mubr.f32.gmra.mxu1 %v2986_v29 }
  0x18   :  { %2529 = vmatprep.mubr.f32.mxu0 %v239_v2  ;;  %2543 = vmatprep.mubr.f32.mxu1 %v3013_v43 }
  0x19   :  { %51 = vperm.xlu0 %2804, %v37_v5  }
  0x1a   :  { %46 = vperm.xlu1 %2805, %v36_v7  }
  0x1b   :  { %2530 = vmatmul.mubr.f32.gmra.mxu0 %v249_v6  ;;  %2544 = vmatmul.mubr.f32.gmra.mxu1 %v3033_v56 }
  0x1c   :  { %2548 = vmatprep.mubr.f32.mxu0 %v2969_v22  ;;  %2562 = vmatprep.mubr.f32.mxu1 %v177_v30 }
  0x1d   :  { %1073 = vperm.xlu0 %2804, %v1055_v8  }
  0x1e   :  { %1068 = vperm.xlu1 %2805, %v1054_v9  }
  0x1f   :  { %2549 = vmatmul.mubr.f32.vlgmr.msra.gmra.mxu0 %v2973_v23  ;;  %2563 = vmatmul.mubr.f32.vlgmr.msra.gmra.mxu1 %v187_v31 }
  0x20   :  { %2575 = vmatpush3.msra.mxu0 %v2978_v26  ;;  %2589 = vmatpush3.msra.mxu1 %v2929_v3  ;;  %v1048_v3 = vld [vmem:[%s3574_s3] sm:$0xff] }
  0x21   :  { %2551 = vmatprep.mubr.f32.mxu0 %v2981_v27  ;;  %2565 = vmatprep.mubr.f32.mxu1 %v197_v36 }
  0x22   :  { %1063 = vperm.xlu0 %2804, %v1053_v12   ;;  %1058 = vperm.xlu1 %2805, %v1052_v13  }
  0x23   :  { %2552 = vmatmul.mubr.f32.gmra.mxu0 %v2984_v28  ;;  %2566 = vmatmul.mubr.f32.gmra.mxu1 %v207_v37 }
  0x24   :  { %2554 = vmatprep.mubr.f32.mxu0 %v2991_v32  ;;  %2568 = vmatprep.mubr.f32.mxu1 %v217_v42 }
  0x26   :  { %1855 = vperm.xlu0 %2804, %v1852_v14  }
  0x27   :  { %2555 = vmatmul.mubr.f32.gmra.mxu0 %v3001_v38  ;;  %2569 = vmatmul.mubr.f32.gmra.mxu1 %v227_v48 }
  0x28   :  { %2557 = vmatprep.mubr.f32.mxu0 %v3029_v52  ;;  %2571 = vmatprep.mubr.f32.mxu1 %v237_v55 }
  0x2b   :  { %2558 = vmatmul.mubr.f32.gmra.mxu0 %v246_v61  ;;  %2572 = vmatmul.mubr.f32.gmra.mxu1 %v247_v62 }
  0x2c   :  { %2576 = vmatprep.mubr.f32.mxu0 %v2942_v10  ;;  %2590 = vmatprep.mubr.f32.mxu1 %v2942_v10  ;;  %v1078_v10 = vsel %vm1076_vm1, %v1048_v3, 0 }
  0x2f   :  { %2577 = vmatmul.mubr.f32.vlgmr.msra.gmra.mxu0 %v2944_v11  ;;  %2591 = vmatmul.mubr.f32.vlgmr.msra.gmra.mxu1 %v2944_v11  ;;  %v3123_v11 = vand.u32 4294901760, %v1078_v10 }
  0x30   :  { %2579 = vmatprep.mubr.f32.mxu0 %v2953_v16  ;;  %2593 = vmatprep.mubr.f32.mxu1 %v2953_v16 }
  0x31   :  { %v3126_v15 = vsub.f32 %v1078_v10, %v3123_v11 }
  0x33   :  { %2580 = vmatmul.mubr.f32.gmra.mxu0 %v2955_v17  ;;  %2594 = vmatmul.mubr.f32.gmra.mxu1 %v2955_v17  ;;  %v1164_v16 = vand.u32 4294901760, %v3126_v15 }
  0x34   :  { %2582 = vmatprep.mubr.f32.mxu0 %v2975_v24  ;;  %2596 = vmatprep.mubr.f32.mxu1 %v2975_v24 }
  0x35   :  { %v1165_v17 = vsub.f32 %v3126_v15, %v1164_v16 }
  0x37   :  { %2583 = vmatmul.mubr.f32.gmra.mxu0 %v2986_v29  ;;  %2597 = vmatmul.mubr.f32.gmra.mxu1 %v2986_v29  ;;  %v1166_v18 = vand.u32 4294901760, %v1165_v17 }
  0x38   :  { %2585 = vmatprep.mubr.f32.mxu0 %v3013_v43  ;;  %2599 = vmatprep.mubr.f32.mxu1 %v3013_v43 }
  0x3b   :  { %2586 = vmatmul.mubr.f32.gmra.mxu0 %v3033_v56  ;;  %2600 = vmatmul.mubr.f32.gmra.mxu1 %v3033_v56 }
  0x3c   :  { %2640 = vmatprep.mubr.f32.mxu1 %v3123_v11  ;;  %2618 = vmatprep.mubr.f32.mxu0 %v1166_v18 }
  0x80   :  { %v82_v19 = vpop.permute.xlu0 %81 }
  0x82   :  { %v72_v22 = vpop.permute.xlu1 %71 }
  0x86   :  { %v3133_v27 = vpop.permute.xlu0 %76  ;;  %v67_v30 = vpop.permute.xlu1 %66 }
  0x90   :  { %v62_v35 = vpop.permute.xlu0 %61 }
  0x91   :  { %v57_v38 = vpop.permute.xlu1 %56 }
  0x94   :  { %v52_v43 = vpop.permute.xlu0 %51 }
  0x95   :  { %v47_v46 = vpop.permute.xlu1 %46 }
  0xcf   :  { %v2522_v20 = vpop.f32.mrf.mxu0  ;;  %v2536_v21 = vpop.f32.mrf.mxu1 }
  0xd0   :  { %v192_v49 = vadd.f32 %v2522_v20, %v52_v43 }
  0xd1   :  { %v181_v23 = vpop.f32.mrf.mxu0  ;;  %v327_v24 = vpop.f32.mrf.mxu1 }
  0xd2   :  { %v182_v52 = vadd.f32 %v181_v23, %v47_v46  ;;  %v334_v55 = vadd.f32 %v2536_v21, %v192_v49 }
  0xd3   :  { %v2525_v25 = vpop.f32.mrf.mxu0  ;;  %v2539_v26 = vpop.f32.mrf.mxu1 }
  0xd4   :  { %v212_v56 = vadd.f32 %v2525_v25, %v62_v35  ;;  %v328_v59 = vadd.f32 %v327_v24, %v182_v52 }
  0xd5   :  { %v201_v28 = vpop.f32.mrf.mxu0  ;;  %v339_v29 = vpop.f32.mrf.mxu1 }
  0xd6   :  { %v202_v61 = vadd.f32 %v201_v28, %v57_v38  ;;  %v346_v1 = vadd.f32 %v2539_v26, %v212_v56 }
  0xd7   :  { %v2528_v31 = vpop.f32.mrf.mxu0  ;;  %v2542_v32 = vpop.f32.mrf.mxu1 }
  0xd8   :  { %v232_v2 = vadd.f32 %v2528_v31, %v72_v22  ;;  %v340_v7 = vadd.f32 %v339_v29, %v202_v61 }
  0xd9   :  { %v221_v33 = vpop.f32.mrf.mxu0  ;;  %v351_v34 = vpop.f32.mrf.mxu1 }
  0xda   :  { %v358_v3 = vadd.f32 %v2542_v32, %v232_v2  ;;  %v222_v10 = vadd.f32 %v221_v33, %v67_v30 }
  0xdb   :  { %v2531_v36 = vpop.f32.mrf.mxu0  ;;  %v2545_v37 = vpop.f32.mrf.mxu1 }
  0xdc   :  { %v252_v21 = vadd.f32 %v2531_v36, %v82_v19  ;;  %v352_v35 = vadd.f32 %v351_v34, %v222_v10 }
  0xdd   :  { %v241_v39 = vpop.f32.mrf.mxu0  ;;  %v3135_v40 = vpop.f32.mrf.mxu1 }
  0xde   :  { %v370_v33 = vadd.f32 %v2545_v37, %v252_v21 }
  0xdf   :  { %v2550_v41 = vpop.f32.mrf.mxu0  ;;  %v2564_v42 = vpop.f32.mrf.mxu1 }
  0xe0   :  { %v451_v60 = vadd.f32 %v2550_v41, %v334_v55 }
  0xe1   :  { %v443_v44 = vpop.f32.mrf.mxu0  ;;  %v566_v45 = vpop.f32.mrf.mxu1 }
  0xe2   :  { %v444_v0 = vadd.f32 %v443_v44, %v328_v59  ;;  %v575_v6 = vadd.f32 %v2564_v42, %v451_v60  ;;  %v242_v42 = vadd.f32 %v241_v39, %v3133_v27 }
  0xe3   :  { %v2553_v47 = vpop.f32.mrf.mxu0  ;;  %v2567_v48 = vpop.f32.mrf.mxu1 }
  0xe4   :  { %v465_v8 = vadd.f32 %v2553_v47, %v346_v1  ;;  %v567_v13 = vadd.f32 %v566_v45, %v444_v0  ;;  %v364_v52 = vadd.f32 %v3135_v40, %v242_v42 }
  0xe5   :  { %v457_v50 = vpop.f32.mrf.mxu0  ;;  %v582_v51 = vpop.f32.mrf.mxu1 }
  0xe6   :  { %v458_v17 = vadd.f32 %v457_v50, %v340_v7  ;;  %v591_v22 = vadd.f32 %v2567_v48, %v465_v8 }
  0xe7   :  { %v2556_v53 = vpop.f32.mrf.mxu0  ;;  %v2570_v54 = vpop.f32.mrf.mxu1 }
  0xe8   :  { %v479_v25 = vadd.f32 %v2556_v53, %v358_v3  ;;  %v583_v38 = vadd.f32 %v582_v51, %v458_v17 }
  0xe9   :  { %v471_v57 = vpop.f32.mrf.mxu0  ;;  %v598_v58 = vpop.f32.mrf.mxu1 }
  0xea   :  { %v607_v43 = vadd.f32 %v2570_v54, %v479_v25  ;;  %v472_v47 = vadd.f32 %v471_v57, %v352_v35 }
  0xeb   :  { %v2559_v62 = vpop.f32.mrf.mxu0  ;;  %v2573_v63 = vpop.f32.mrf.mxu1 }
  0xec   :  { %v493_v48 = vadd.f32 %v2559_v62, %v370_v33  ;;  %v599_v59 = vadd.f32 %v598_v58, %v472_v47 }
  0xed   :  { %v485_v4 = vpop.f32.mrf.mxu0  ;;  %v3137_v5 = vpop.f32.mrf.mxu1 }
  0xee   :  { %v623_v60 = vadd.f32 %v2573_v63, %v493_v48  ;;  %v486_v61 = vadd.f32 %v485_v4, %v364_v52 }
  0xef   :  { %v2578_v9 = vpop.f32.mrf.mxu0  ;;  %v2592_v12 = vpop.f32.mrf.mxu1 }
  0xf0   :  { %v703_v14 = vadd.f32 %v2578_v9, %v575_v6 }
  0xf1   :  { %v696_v18 = vpop.f32.mrf.mxu0  ;;  %v810_v20 = vpop.f32.mrf.mxu1 }
  0xf2   :  { %v3139_v23 = vadd.f32 %v2592_v12, %v703_v14  ;;  %v697_v24 = vadd.f32 %v696_v18, %v567_v13  ;;  %v615_v14 = vadd.f32 %v3137_v5, %v486_v61 }
  0xf3   :  { %v2581_v26 = vpop.f32.mrf.mxu0  ;;  %v2595_v28 = vpop.f32.mrf.mxu1 }
  0xf4   :  { %v857_v29 = vmul.f32 0.70710677, %v3139_v23  ;;  %v3142_v31 = vadd.f32 %v810_v20, %v697_v24  ;;  %v715_v41 = vadd.f32 %v2581_v26, %v591_v22  ;;  %vm1017_vm7 = vcmp.ge.f32.partialorder %v3139_v23, 0.0 }
  0xf5   :  { %v708_v32 = vpop.f32.mrf.mxu0  ;;  %v822_v30 = vpop.f32.mrf.mxu1 }
  0xf6   :  { %v3145_v19 = vand.u32 2147483647, %v857_v29  ;;  %v856_v36 = vmul.f32 0.70710677, %v3142_v31  ;;  %v3148_v44 = vadd.f32 %v2595_v28, %v715_v41  ;;  %v709_v45 = vadd.f32 %v708_v32, %v583_v38 }
  0xf7   :  { %v2584_v46 = vpop.f32.mrf.mxu0  ;;  %v2598_v39 = vpop.f32.mrf.mxu1  ;;  %vm1016_vm9 = vcmp.ge.f32.partialorder %v3142_v31, 0.0 }
  0xf8   :  { %v873_v34 = vmul.f32 0.3275911, %v3145_v19  ;;  %v3151_v49 = vand.u32 2147483647, %v856_v36  ;;  %v859_v50 = vmul.f32 0.70710677, %v3148_v44  ;;  %v3154_v37 = vadd.f32 %v822_v30, %v709_v45 }
  0xf9   :  { %v727_v27 = vadd.f32 %v2584_v46, %v607_v43  ;;  %v720_v51 = vpop.f32.mrf.mxu0  ;;  %v834_v6 = vpop.f32.mrf.mxu1  ;;  %vm1019_vm2 = vcmp.ge.f32.partialorder %v3148_v44, 0.0 }
  0xfa   :  { %v881_v53 = vadd.f32 1.0, %v873_v34  ;;  %v872_v54 = vmul.f32 0.3275911, %v3151_v49  ;;  %v867_v55 = vand.u32 2147483647, %v859_v50  ;;  %v721_v7 = vadd.f32 %v720_v51, %v599_v59 }
  0xfb   :  { %v858_v56 = vmul.f32 0.70710677, %v3154_v37  ;;  %v2587_v57 = vpop.f32.mrf.mxu0  ;;  %v3159_v2 = vadd.f32 %v2598_v39, %v727_v27  ;;  %v2601_v63 = vpop.f32.mrf.mxu1  ;;  %v969_v59 = vmul.f32 %v3145_v19, %v3145_v19  ;;  %vm1018_vm6 = vcmp.ge.f32.partialorder %v3154_v37, 0.0 }
  0xfc   :  { %v880_v62 = vadd.f32 1.0, %v872_v54  ;;  %2806 = vrcp.f32 %v881_v53  ;;  %v875_v0 = vmul.f32 0.3275911, %v867_v55  ;;  %v739_v8 = vadd.f32 %v2587_v57, %v623_v60 }
  0xfd   :  { %v866_v1 = vand.u32 2147483647, %v858_v56  ;;  %v861_v12 = vmul.f32 0.70710677, %v3159_v2  ;;  %v732_v13 = vpop.f32.mrf.mxu0  ;;  %v3163_v3 = vadd.f32 %v834_v6, %v721_v7  ;;  %v846_v22 = vpop.f32.mrf.mxu1  ;;  %v971_v39 = vmul.f32 %v867_v55, %v867_v55 }
  0xfe   :  { %2808 = vrcp.f32 %v880_v62  ;;  %v883_v40 = vadd.f32 1.0, %v875_v0  ;;  %v3165_v10 = vadd.f32 %v2601_v63, %v739_v8  ;;  %v733_v17 = vadd.f32 %v732_v13, %v615_v14 }
  0xff   :  { %v874_v9 = vmul.f32 0.3275911, %v866_v1  ;;  %v869_v4 = vand.u32 2147483647, %v861_v12  ;;  %v860_v20 = vmul.f32 0.70710677, %v3163_v3  ;;  %v970_v52 = vmul.f32 %v866_v1, %v866_v1 }
 0x100   :  { %2810 = vrcp.f32 %v883_v40  ;;  %v863_v21 = vmul.f32 0.70710677, %v3165_v10  ;;  %v3169_v5 = vadd.f32 %v846_v22, %v733_v17  ;;  %v968_v60 = vmul.f32 %v3151_v49, %v3151_v49 }
 0x101   :  { %v882_v58 = vadd.f32 1.0, %v874_v9  ;;  %v877_v18 = vmul.f32 0.3275911, %v869_v4  ;;  %v868_v25 = vand.u32 2147483647, %v860_v20  ;;  %v973_v43 = vmul.f32 %v869_v4, %v869_v4 }
 0x102   :  { %v871_v26 = vand.u32 2147483647, %v863_v21  ;;  %v862_v38 = vmul.f32 0.70710677, %v3169_v5  ;;  %v979_v6 = vsub.f32 0.0, %v971_v39  ;;  %v978_v8 = vsub.f32 0.0, %v970_v52 }
 0x103   :  { %2812 = vrcp.f32 %v882_v58  ;;  %v885_v24 = vadd.f32 1.0, %v877_v18  ;;  %v876_v28 = vmul.f32 0.3275911, %v868_v25  ;;  %v981_v53 = vsub.f32 0.0, %v973_v43 }
 0x104   :  { %v879_v29 = vmul.f32 0.3275911, %v871_v26  ;;  %v870_v33 = vand.u32 2147483647, %v862_v38  ;;  %v972_v57 = vmul.f32 %v868_v25, %v868_v25  ;;  %v975_v1 = vmul.f32 %v871_v26, %v871_v26 }
 0x105   :  { %2814 = vrcp.f32 %v885_v24  ;;  %v884_v41 = vadd.f32 1.0, %v876_v28  ;;  %v994_v9 = vmul.f32 1.442695, %v981_v53  ;;  %v977_v13 = vsub.f32 0.0, %v969_v59 }
 0x106   :  { %v887_v32 = vadd.f32 1.0, %v879_v29  ;;  %v878_v45 = vmul.f32 0.3275911, %v870_v33  ;;  %v980_v19 = vsub.f32 0.0, %v972_v57  ;;  %v976_v4 = vsub.f32 0.0, %v968_v60 }
 0x107   :  { %2816 = vrcp.f32 %v884_v41  ;;  %v990_v17 = vmul.f32 1.442695, %v979_v6  ;;  %v983_v18 = vsub.f32 0.0, %v975_v1  ;;  %v988_v24 = vmul.f32 1.442695, %v978_v8 }
 0x108   :  { %2818 = vrcp.f32 %v887_v32  ;;  %v886_v48 = vadd.f32 1.0, %v878_v45  ;;  %v992_v29 = vmul.f32 1.442695, %v980_v19  ;;  %v986_v39 = vmul.f32 1.442695, %v977_v13 }
 0x109   :  { %v3171_v35 = vpop.eup %2806  ;;  %v984_v59 = vmul.f32 1.442695, %v976_v4  ;;  %vm1021_vm3 = vcmp.ge.f32.partialorder %v3159_v2, 0.0  ;;  %vm1020_vm4 = vcmp.ge.f32.partialorder %v3163_v3, 0.0  ;;  %vm1023_vm5 = vcmp.ge.f32.partialorder %v3165_v10, 0.0 }
 0x10a   :  { %v897_v42 = vmul.f32 1.0614054, %v3171_v35  ;;  %2820 = vrcp.f32 %v886_v48  ;;  %vm1022_vm8 = vcmp.ge.f32.partialorder %v3169_v5, 0.0 }
 0x10b   :  { %v3174_v30 = vpop.eup %2808  ;;  %2822 = vpow2.f32 %v994_v9 }
 0x10c   :  { %v896_v46 = vmul.f32 1.0614054, %v3174_v30  ;;  %v905_v50 = vadd.f32 -1.4531521, %v897_v42  ;;  %v974_v42 = vmul.f32 %v870_v33, %v870_v33  ;;  %2824 = vpow2.f32 %v990_v17 }
 0x10d   :  { %v3177_v36 = vpop.eup %2810  ;;  %2826 = vpow2.f32 %v988_v24  ;;  %v1049_v24 = vld [vmem:[%s3574_s3 + $0x8] sm:$0xff] }
 0x10e   :  { %v899_v47 = vmul.f32 1.0614054, %v3177_v36  ;;  %v904_v54 = vadd.f32 -1.4531521, %v896_v46  ;;  %v913_v55 = vmul.f32 %v3171_v35, %v905_v50  ;;  %v998_v46 = vmul.f32 1.442695, %v983_v18 }
 0x10f   :  { %2828 = vpow2.f32 %v992_v29 }
 0x110   :  { %v3181_v34 = vpop.eup %2812  ;;  %v907_v27 = vadd.f32 -1.4531521, %v899_v47  ;;  %v912_v12 = vmul.f32 %v3174_v30, %v904_v54  ;;  %v921_v63 = vadd.f32 1.4214138, %v913_v55  ;;  %2830 = vpow2.f32 %v998_v46 }
 0x111   :  { %v898_v51 = vmul.f32 1.0614054, %v3181_v34  ;;  %2832 = vpow2.f32 %v986_v39 }
 0x112   :  { %v915_v56 = vmul.f32 %v3177_v36, %v907_v27  ;;  %v3189_v62 = vpop.eup %2814  ;;  %v920_v26 = vadd.f32 1.4214138, %v912_v12  ;;  %v929_v43 = vmul.f32 %v3171_v35, %v921_v63  ;;  %2834 = vpow2.f32 %v984_v59 }
 0x113   :  { %v906_v61 = vadd.f32 -1.4531521, %v898_v51  ;;  %v901_v40 = vmul.f32 1.0614054, %v3189_v62 }
 0x114   :  { %v923_v0 = vadd.f32 1.4214138, %v915_v56  ;;  %v3196_v20 = vpop.eup %2816  ;;  %v928_v51 = vmul.f32 %v3174_v30, %v920_v26  ;;  %v982_v56 = vsub.f32 0.0, %v974_v42  ;;  %v937_v57 = vadd.f32 -0.28449672, %v929_v43 }
 0x115   :  { %v914_v7 = vmul.f32 %v3181_v34, %v906_v61  ;;  %v909_v58 = vadd.f32 -1.4531521, %v901_v40  ;;  %v3200_v25 = vpop.eup %2818  ;;  %v900_v28 = vmul.f32 1.0614054, %v3196_v20  ;;  %v3229_v42 = vsel %vm1076_vm1, %v1049_v24, 0 }
 0x116   :  { %v931_v49 = vmul.f32 %v3177_v36, %v923_v0  ;;  %v903_v32 = vmul.f32 1.0614054, %v3200_v25  ;;  %v936_v1 = vadd.f32 -0.28449672, %v928_v51  ;;  %v996_v12 = vmul.f32 1.442695, %v982_v56 }
 0x117   :  { %v922_v14 = vadd.f32 1.4214138, %v914_v7  ;;  %v917_v22 = vmul.f32 %v3189_v62, %v909_v58  ;;  %v908_v45 = vadd.f32 -1.4531521, %v900_v28  ;;  %v3206_v27 = vpop.eup %2820  ;;  %v945_v19 = vmul.f32 %v3171_v35, %v937_v57 }
 0x118   :  { %v939_v38 = vadd.f32 -0.28449672, %v931_v49  ;;  %v911_v50 = vadd.f32 -1.4531521, %v903_v32  ;;  %v902_v6 = vmul.f32 1.0614054, %v3206_v27  ;;  %v2823_v63 = vpop.eup %2822  ;;  %v944_v4 = vmul.f32 %v3174_v30, %v936_v1 }
 0x119   :  { %v930_v21 = vmul.f32 %v3181_v34, %v922_v14  ;;  %v925_v41 = vadd.f32 1.4214138, %v917_v22  ;;  %v916_v52 = vmul.f32 %v3196_v20, %v908_v45  ;;  %2836 = vpow2.f32 %v996_v12 }
 0x11a   :  { %v947_v33 = vmul.f32 %v3177_v36, %v939_v38  ;;  %v919_v54 = vmul.f32 %v3200_v25, %v911_v50  ;;  %v910_v49 = vadd.f32 -1.4531521, %v902_v6  ;;  %v953_v28 = vadd.f32 0.2548296, %v945_v19 }
 0x11b   :  { %v938_v47 = vadd.f32 -0.28449672, %v930_v21  ;;  %v933_v48 = vmul.f32 %v3189_v62, %v925_v41  ;;  %v924_v60 = vadd.f32 1.4214138, %v916_v52  ;;  %v2825_v41 = vpop.eup %2824  ;;  %v952_v45 = vadd.f32 0.2548296, %v944_v4 }
 0x11c   :  { %v927_v0 = vadd.f32 1.4214138, %v919_v54  ;;  %v955_v8 = vadd.f32 0.2548296, %v947_v33  ;;  %v918_v21 = vmul.f32 %v3206_v27, %v910_v49  ;;  %v2827_v43 = vpop.eup %2826  ;;  %v961_v51 = vmul.f32 %v3171_v35, %v953_v28  ;;  %v1051_v49 = vld [vmem:[%s3574_s3 + $0x18] sm:$0xff] }
 0x11d   :  { %v941_v53 = vadd.f32 -0.28449672, %v933_v48  ;;  %v946_v61 = vmul.f32 %v3181_v34, %v938_v47  ;;  %v932_v7 = vmul.f32 %v3196_v20, %v924_v60  ;;  %v2829_v48 = vpop.eup %2828  ;;  %v3237_v56 = vand.u32 4294901760, %v3229_v42 }
 0x11e   :  { %v935_v9 = vmul.f32 %v3200_v25, %v927_v0  ;;  %v963_v22 = vmul.f32 %v3177_v36, %v955_v8  ;;  %v926_v38 = vadd.f32 1.4214138, %v918_v21  ;;  %v1013_v35 = vmul.f32 0.5, %v3159_v2 }
 0x11f   :  { %v949_v55 = vmul.f32 %v3189_v62, %v941_v53  ;;  %v940_v13 = vadd.f32 -0.28449672, %v932_v7  ;;  %v954_v14 = vadd.f32 0.2548296, %v946_v61  ;;  %v2831_v53 = vpop.eup %2830  ;;  %v1015_v6 = vmul.f32 0.5, %v3165_v10 }
 0x120   :  { %v943_v18 = vadd.f32 -0.28449672, %v935_v9  ;;  %v934_v36 = vmul.f32 %v3206_v27, %v926_v38  ;;  %v1003_v50 = vmul.f32 %v2825_v41, %v963_v22  ;;  %v2833_v60 = vpop.eup %2832  ;;  %v1012_v19 = vmul.f32 0.5, %v3163_v3 }
 0x121   :  { %v957_v40 = vadd.f32 0.2548296, %v949_v55  ;;  %v948_v17 = vmul.f32 %v3196_v20, %v940_v13  ;;  %v962_v32 = vmul.f32 %v3181_v34, %v954_v14  ;;  %v1001_v0 = vmul.f32 %v2833_v60, %v961_v51  ;;  %v2835_v7 = vpop.eup %2834 }
 0x122   :  { %v942_v54 = vadd.f32 -0.28449672, %v934_v36  ;;  %v1027_v61 = vsub.f32 2.0, %v1003_v50 }
 0x123   :  { %v965_v58 = vmul.f32 %v3189_v62, %v957_v40  ;;  %v956_v29 = vadd.f32 0.2548296, %v948_v17  ;;  %v951_v62 = vmul.f32 %v3200_v25, %v943_v18  ;;  %v1002_v34 = vmul.f32 %v2827_v43, %v962_v32 }
 0x124   :  { %v1035_v14 = vsel %vm1019_vm2, %v1027_v61, %v1003_v50  ;;  %v1025_v10 = vsub.f32 2.0, %v1001_v0  ;;  %v1011_v18 = vmul.f32 0.5, %v3148_v44  ;;  %v1014_v44 = vmul.f32 0.5, %v3169_v5 }
 0x125   :  { %v1005_v26 = vmul.f32 %v2823_v63, %v965_v58  ;;  %v964_v46 = vmul.f32 %v3196_v20, %v956_v29  ;;  %v959_v47 = vadd.f32 0.2548296, %v951_v62  ;;  %v960_v20 = vmul.f32 %v3174_v30, %v952_v45  ;;  %v1050_v30 = vld [vmem:[%s3574_s3 + $0x10] sm:$0xff] }
 0x126   :  { %v1026_v8 = vsub.f32 2.0, %v1002_v34  ;;  %v1084_v4 = vsel %vm1076_vm1, %v1050_v30, 0  ;;  %v2837_v17 = vpop.eup %2836  ;;  %v1043_v29 = vmul.f32 %v1035_v14, %v1011_v18  ;;  %v1010_v62 = vmul.f32 0.5, %v3154_v37 }
 0x127   :  { %v1029_v39 = vsub.f32 2.0, %v1005_v26  ;;  %v1004_v52 = vmul.f32 %v2829_v48, %v964_v46  ;;  %v967_v33 = vmul.f32 %v3200_v25, %v959_v47  ;;  %v950_v25 = vmul.f32 %v3206_v27, %v942_v54 }
 0x128   :  { %v1000_v2 = vmul.f32 %v2835_v7, %v960_v20  ;;  %v1034_v21 = vsel %vm1018_vm6, %v1026_v8, %v1002_v34  ;;  %v1033_v32 = vsel %vm1017_vm7, %v1025_v10, %v1001_v0  ;;  %v1009_v37 = vmul.f32 0.5, %v3139_v23 }
 0x129   :  { %v1028_v57 = vsub.f32 2.0, %v1004_v52  ;;  %v1007_v59 = vmul.f32 %v2831_v53, %v967_v33  ;;  %v1037_v55 = vsel %vm1021_vm3, %v1029_v39, %v1005_v26  ;;  %v958_v9 = vadd.f32 0.2548296, %v950_v25 }
 0x12a   :  { %v1045_v12 = vmul.f32 %v1037_v55, %v1013_v35  ;;  %v1087_v26 = vsel %vm1076_vm1, %v1051_v49, 0  ;;  %v1024_v28 = vsub.f32 2.0, %v1000_v2  ;;  %v1042_v43 = vmul.f32 %v1034_v21, %v1010_v62 }
 0x12b   :  { %v1031_v1 = vsub.f32 2.0, %v1007_v59  ;;  %v1036_v40 = vsel %vm1020_vm4, %v1028_v57, %v1004_v52  ;;  %v966_v63 = vmul.f32 %v3206_v27, %v958_v9  ;;  %v3280_v48 = vand.u32 4294901760, %v1043_v29 }
 0x12c   :  { %v1044_v3 = vmul.f32 %v1036_v40, %v1012_v19  ;;  %v3263_v27 = vand.u32 4294901760, %v1045_v12  ;;  %v1032_v36 = vsel %vm1016_vm9, %v1024_v28, %v1000_v2  ;;  %v1041_v51 = vmul.f32 %v1033_v32, %v1009_v37 }
 0x12d   :  { %v1039_v13 = vsel %vm1023_vm5, %v1031_v1, %v1007_v59  ;;  %v1006_v22 = vmul.f32 %v2837_v17, %v966_v63  ;;  %v1008_v5 = vmul.f32 0.5, %v3142_v31  ;;  %v3288_v23 = vand.u32 4294901760, %v1084_v4 }
 0x12e   :  { %v1047_v58 = vmul.f32 %v1039_v13, %v1015_v6  ;;  %v3271_v45 = vand.u32 4294901760, %v1044_v3  ;;  %v3283_v50 = vsub.f32 %v1045_v12, %v3263_v27  ;;  %v3290_v33 = vand.u32 4294901760, %v1042_v43 }
 0x12f   :  { %v1030_v41 = vsub.f32 2.0, %v1006_v22  ;;  %v3299_v54 = vsub.f32 %v3229_v42, %v3237_v56  ;;  %v1040_v20 = vmul.f32 %v1032_v36, %v1008_v5  ;;  %v3301_v59 = vand.u32 4294901760, %v1087_v26  ;;  %v1074_v36 = vpop.permute.xlu0 %1073 }
 0x130   :  { %v3259_v24 = vand.u32 4294901760, %v1047_v58  ;;  %v3293_v53 = vsub.f32 %v1044_v3, %v3271_v45  ;;  %v3304_v31 = vsub.f32 %v1043_v29, %v3280_v48  ;;  %v3311_v61 = vand.u32 4294901760, %v3283_v50 }
 0x131   :  { %v1038_v46 = vsel %vm1022_vm8, %v1030_v41, %v1006_v22  ;;  %v3313_v35 = vand.u32 4294901760, %v1041_v51  ;;  %v3317_v42 = vsub.f32 %v1084_v4, %v3288_v23  ;;  %v3320_v55 = vsub.f32 %v1042_v43, %v3290_v33 }
 0x132   :  { %v3267_v38 = vsub.f32 %v1047_v58, %v3259_v24  ;;  %2602 = vmatprep.subr.mxu0 %v3259_v24  ;;  %v1046_v39 = vmul.f32 %v1038_v46, %v1014_v44  ;;  %v3327_v0 = vand.u32 4294901760, %v3293_v53  ;;  %v1174_v6 = vand.u32 4294901760, %v3299_v54 }
 0x133   :  { %2603 = vmatpush3.msra.mxu0 %v3259_v24  ;;  %v3330_v1 = vand.u32 4294901760, %v1040_v20  ;;  %v3334_v30 = vsub.f32 %v1087_v26, %v3301_v59  ;;  %v1236_v8 = vsub.f32 %v3283_v50, %v3311_v61  ;;  %v3342_v40 = vand.u32 4294901760, %v3304_v31 }
 0x134   :  { %v3278_v47 = vand.u32 4294901760, %v3267_v38  ;;  %v3295_v34 = vand.u32 4294901760, %v1046_v39  ;;  %v3345_v9 = vsub.f32 %v1041_v51, %v3313_v35  ;;  %v1184_v2 = vand.u32 4294901760, %v3317_v42 }
 0x135   :  { %v1243_v19 = vsub.f32 %v3293_v53, %v3327_v0  ;;  %v1175_v13 = vsub.f32 %v3299_v54, %v1174_v6  ;;  %v3356_v49 = vand.u32 4294901760, %v3320_v55  ;;  %v3359_v14 = vsub.f32 %v1040_v20, %v3330_v1 }
 0x136   :  { %v1222_v52 = vsub.f32 %v3267_v38, %v3278_v47  ;;  %v3307_v60 = vsub.f32 %v1046_v39, %v3295_v34  ;;  %2604 = vmatprep.subr.mxu0 %v3295_v34  ;;  %v1194_v58 = vand.u32 4294901760, %v3334_v30  ;;  %v1237_v63 = vand.u32 4294901760, %v1236_v8  ;;  %v1069_v39 = vpop.permute.xlu1 %1068 }
 0x137   :  { %2605 = vmatpush3.msra.mxu0 %v3295_v34  ;;  %v1250_v4 = vsub.f32 %v3304_v31, %v3342_v40  ;;  %v1185_v17 = vsub.f32 %v3317_v42, %v1184_v2  ;;  %v3371_v10 = vand.u32 4294901760, %v3345_v9  ;;  %v1244_v18 = vand.u32 4294901760, %v1243_v19 }
 0x138   :  { %v1223_v57 = vand.u32 4294901760, %v1222_v52  ;;  %2606 = vmatprep.subr.mxu0 %v3263_v27  ;;  %v3324_v25 = vand.u32 4294901760, %v3307_v60  ;;  %v1176_v3 = vand.u32 4294901760, %v1175_v13  ;;  %v1257_v21 = vsub.f32 %v3320_v55, %v3356_v49  ;;  %v1064_v52 = vpop.permute.xlu0 %1063 }
 0x139   :  { %2607 = vmatpush3.msra.mxu0 %v3263_v27  ;;  %v1195_v22 = vsub.f32 %v3334_v30, %v1194_v58  ;;  %v3381_v26 = vand.u32 4294901760, %v3359_v14  ;;  %v1251_v28 = vand.u32 4294901760, %v1250_v4  ;;  %v1186_v29 = vand.u32 4294901760, %v1185_v17 }
 0x13a   :  { %2624 = vmatprep.subr.mxu1 %v1223_v57  ;;  %2608 = vmatprep.subr.mxu0 %v3271_v45  ;;  %v1229_v7 = vsub.f32 %v3307_v60, %v3324_v25  ;;  %v1264_v62 = vsub.f32 %v3345_v9, %v3371_v10  ;;  %v1258_v44 = vand.u32 4294901760, %v1257_v21 }
 0x13b   :  { %2625 = vmatpush3.msra.mxu1 %v1223_v57  ;;  %2609 = vmatpush3.msra.mxu0 %v3271_v45  ;;  %v1196_v41 = vand.u32 4294901760, %v1195_v22  ;;  %v1271_v32 = vsub.f32 %v3359_v14, %v3381_v26 }
 0x13c   :  { %2610 = vmatprep.subr.mxu0 %v3280_v48  ;;  %v1230_v12 = vand.u32 4294901760, %v1229_v7  ;;  %v1265_v43 = vand.u32 4294901760, %v1264_v62 }
 0x13d   :  { %2611 = vmatpush3.msra.mxu0 %v3280_v48  ;;  %v1272_v37 = vand.u32 4294901760, %v1271_v32 }
 0x13e   :  { %2612 = vmatprep.subr.mxu0 %v3290_v33  ;;  %2626 = vmatprep.subr.mxu1 %v1230_v12 }
 0x13f   :  { %2613 = vmatpush3.msra.mxu0 %v3290_v33  ;;  %2627 = vmatpush3.msra.mxu1 %v1230_v12 }
 0x140   :  { %2614 = vmatprep.subr.mxu0 %v3313_v35  ;;  %2628 = vmatprep.subr.mxu1 %v1237_v63 }
 0x141   :  { %2615 = vmatpush3.msra.mxu0 %v3313_v35  ;;  %2629 = vmatpush3.msra.mxu1 %v1237_v63 }
 0x142   :  { %2616 = vmatprep.subr.mxu0 %v3330_v1  ;;  %2630 = vmatprep.subr.mxu1 %v1244_v18 }
 0x143   :  { %2617 = vmatpush3.msra.mxu0 %v3330_v1  ;;  %2631 = vmatpush3.msra.mxu1 %v1244_v18 }
 0x144   :  { %2619 = vmatmul.mubr.f32.vlgmr.msra.gmra.mxu0 %v1176_v3  ;;  %2632 = vmatprep.subr.mxu1 %v1251_v28 }
 0x145   :  { %2646 = vmatprep.subr.mxu0 %v3267_v38  ;;  %2633 = vmatpush3.msra.mxu1 %v1251_v28 }
 0x146   :  { %2647 = vmatpush3.msra.mxu0 %v3267_v38  ;;  %2634 = vmatprep.subr.mxu1 %v1258_v44 }
 0x147   :  { %2648 = vmatprep.subr.mxu0 %v3307_v60  ;;  %2621 = vmatprep.mubr.f32.mxu0 %v1186_v29 }
 0x148   :  { %2635 = vmatpush3.msra.mxu1 %v1258_v44  ;;  %2649 = vmatpush3.msra.mxu0 %v3307_v60 }
 0x149   :  { %2622 = vmatmul.mubr.f32.gmra.mxu0 %v1196_v41  ;;  %2636 = vmatprep.subr.mxu1 %v1265_v43 }
 0x14a   :  { %2650 = vmatprep.subr.mxu0 %v3283_v50  ;;  %2637 = vmatpush3.msra.mxu1 %v1265_v43 }
 0x14b   :  { %2651 = vmatpush3.msra.mxu0 %v3283_v50  ;;  %2638 = vmatprep.subr.mxu1 %v1272_v37 }
 0x14c   :  { %2652 = vmatprep.subr.mxu0 %v3293_v53  ;;  %2639 = vmatpush3.msra.mxu1 %v1272_v37 }
 0x14d   :  { %2653 = vmatpush3.msra.mxu0 %v3293_v53  ;;  %2641 = vmatmul.mubr.f32.vlgmr.msra.gmra.mxu1 %v3237_v56 }
 0x14e   :  { %2654 = vmatprep.subr.mxu0 %v3304_v31  ;;  %2668 = vmatprep.subr.mxu1 %v3259_v24 }
 0x14f   :  { %2655 = vmatpush3.msra.mxu0 %v3304_v31  ;;  %2669 = vmatpush3.msra.mxu1 %v3259_v24 }
 0x150   :  { %2656 = vmatprep.subr.mxu0 %v3320_v55  ;;  %2670 = vmatprep.subr.mxu1 %v3295_v34 }
 0x151   :  { %2643 = vmatprep.mubr.f32.mxu1 %v3288_v23  ;;  %2657 = vmatpush3.msra.mxu0 %v3320_v55 }
 0x152   :  { %2671 = vmatpush3.msra.mxu1 %v3295_v34  ;;  %2658 = vmatprep.subr.mxu0 %v3345_v9 }
 0x153   :  { %2644 = vmatmul.mubr.f32.gmra.mxu1 %v3301_v59  ;;  %2672 = vmatprep.subr.mxu1 %v3263_v27 }
 0x154   :  { %2659 = vmatpush3.msra.mxu0 %v3345_v9  ;;  %2673 = vmatpush3.msra.mxu1 %v3263_v27 }
 0x155   :  { %2660 = vmatprep.subr.mxu0 %v3359_v14  ;;  %2674 = vmatprep.subr.mxu1 %v3271_v45 }
 0x156   :  { %2661 = vmatpush3.msra.mxu0 %v3359_v14  ;;  %2662 = vmatprep.mubr.f32.mxu0 %v3126_v15 }
 0x157   :  { %2675 = vmatpush3.msra.mxu1 %v3271_v45  ;;  %2663 = vmatmul.mubr.f32.vlgmr.msra.gmra.mxu0 %v3299_v54 }
 0x158   :  { %2676 = vmatprep.subr.mxu1 %v3280_v48  ;;  %2690 = vmatprep.subr.mxu0 %v3278_v47 }
 0x159   :  { %2677 = vmatpush3.msra.mxu1 %v3280_v48  ;;  %2691 = vmatpush3.msra.mxu0 %v3278_v47 }
 0x15a   :  { %2678 = vmatprep.subr.mxu1 %v3290_v33  ;;  %2692 = vmatprep.subr.mxu0 %v3324_v25 }
 0x15b   :  { %2665 = vmatprep.mubr.f32.mxu0 %v3317_v42  ;;  %2679 = vmatpush3.msra.mxu1 %v3290_v33 }
 0x15c   :  { %2693 = vmatpush3.msra.mxu0 %v3324_v25  ;;  %2680 = vmatprep.subr.mxu1 %v3313_v35 }
 0x15d   :  { %2666 = vmatmul.mubr.f32.gmra.mxu0 %v3334_v30  ;;  %2694 = vmatprep.subr.mxu0 %v3311_v61 }
 0x15e   :  { %2681 = vmatpush3.msra.mxu1 %v3313_v35  ;;  %2695 = vmatpush3.msra.mxu0 %v3311_v61 }
 0x15f   :  { %2682 = vmatprep.subr.mxu1 %v3330_v1  ;;  %2696 = vmatprep.subr.mxu0 %v3327_v0 }
 0x160   :  { %2683 = vmatpush3.msra.mxu1 %v3330_v1  ;;  %2684 = vmatprep.mubr.f32.mxu1 %v1164_v16 }
 0x161   :  { %2697 = vmatpush3.msra.mxu0 %v3327_v0  ;;  %2685 = vmatmul.mubr.f32.vlgmr.msra.gmra.mxu1 %v1174_v6 }
 0x162   :  { %2698 = vmatprep.subr.mxu0 %v3342_v40  ;;  %2712 = vmatprep.subr.mxu1 %v3259_v24 }
 0x163   :  { %2699 = vmatpush3.msra.mxu0 %v3342_v40  ;;  %2713 = vmatpush3.msra.mxu1 %v3259_v24 }
 0x164   :  { %2700 = vmatprep.subr.mxu0 %v3356_v49  ;;  %2714 = vmatprep.subr.mxu1 %v3295_v34 }
 0x165   :  { %2687 = vmatprep.mubr.f32.mxu1 %v1184_v2  ;;  %2701 = vmatpush3.msra.mxu0 %v3356_v49 }
 0x166   :  { %2715 = vmatpush3.msra.mxu1 %v3295_v34  ;;  %2702 = vmatprep.subr.mxu0 %v3371_v10  ;;  %v1059_v34 = vpop.permute.xlu1 %1058 }
 0x167   :  { %2688 = vmatmul.mubr.f32.gmra.mxu1 %v1194_v58  ;;  %2716 = vmatprep.subr.mxu1 %v3263_v27 }
 0x168   :  { %2703 = vmatpush3.msra.mxu0 %v3371_v10  ;;  %2717 = vmatpush3.msra.mxu1 %v3263_v27 }
 0x169   :  { %2704 = vmatprep.subr.mxu0 %v3381_v26  ;;  %2718 = vmatprep.subr.mxu1 %v3271_v45 }
 0x16a   :  { %2705 = vmatpush3.msra.mxu0 %v3381_v26  ;;  %2706 = vmatprep.mubr.f32.mxu0 %v3123_v11 }
 0x16b   :  { %2719 = vmatpush3.msra.mxu1 %v3271_v45  ;;  %2707 = vmatmul.mubr.f32.vlgmr.msra.gmra.mxu0 %v3237_v56 }
 0x16c   :  { %2720 = vmatprep.subr.mxu1 %v3280_v48  ;;  %2709 = vmatprep.mubr.f32.mxu0 %v3288_v23 }
 0x16d   :  { %2721 = vmatpush3.msra.mxu1 %v3280_v48  ;;  %2728 = vmatprep.mubr.f32.mxu1 %v3123_v11  ;;  %v2877_v11 = vmov 0.0  }
 0x16e   :  { %2722 = vmatprep.subr.mxu1 %v3290_v33  ;;  %2734 = vmatprep.subr.mxu0 %v2877_v11 }
 0x16f   :  { %2723 = vmatpush3.msra.mxu1 %v3290_v33  ;;  %2710 = vmatmul.mubr.f32.gmra.mxu0 %v3301_v59 }
 0x170   :  { %2724 = vmatprep.subr.mxu1 %v3313_v35  ;;  %2742 = vmatprep.mubr.msk.f32.mxu0 %vm2878_vm10, %v2877_v11 }
 0x171   :  { %2725 = vmatpush3.msra.mxu1 %v3313_v35 }
 0x172   :  { %2726 = vmatprep.subr.mxu1 %v3330_v1 }
 0x173   :  { %2727 = vmatpush3.msra.mxu1 %v3330_v1 }
 0x174   :  { %2729 = vmatmul.mubr.f32.vlgmr.msra.gmra.mxu1 %v3237_v56  ;;  %2745 = vmatprep.subr.mxu1 %v2877_v11 }
 0x175   :  { %2731 = vmatprep.mubr.f32.mxu1 %v3288_v23 }
 0x178   :  { %2732 = vmatmul.mubr.f32.gmra.mxu1 %v3301_v59 }
 0x179   :  { %2753 = vmatprep.mubr.msk.f32.mxu1 %vm2878_vm10, %v2877_v11 }
 0x204   :  { %v2620_v15 = vpop.f32.mrf.mxu0 }
 0x205   :  { %v1179_v33 = vadd.f32 %v2620_v15, %v1064_v52 }
 0x206   :  { %v1168_v16 = vpop.f32.mrf.mxu0 }
 0x207   :  { %v1169_v54 = vadd.f32 %v1168_v16, %v1059_v34 }
 0x209   :  { %v2623_v24 = vpop.f32.mrf.mxu0 }
 0x20a   :  { %v1199_v61 = vadd.f32 %v2623_v24, %v1074_v36 }
 0x20b   :  { %v1188_v27 = vpop.f32.mrf.mxu0 }
 0x20c   :  { %v1189_v35 = vadd.f32 %v1188_v27, %v1069_v39 }
 0x20d   :  { %v2642_v56 = vpop.f32.mrf.mxu1 }
 0x20e   :  { %v1316_v20 = vadd.f32 %v2642_v56, %v1179_v33 }
 0x20f   :  { %v1309_v38 = vpop.f32.mrf.mxu1 }
 0x210   :  { %v1310_v31 = vadd.f32 %v1309_v38, %v1169_v54 }
 0x213   :  { %v2645_v46 = vpop.f32.mrf.mxu1 }
 0x214   :  { %v1328_v25 = vadd.f32 %v2645_v46, %v1199_v61 }
 0x215   :  { %v1321_v48 = vpop.f32.mrf.mxu1 }
 0x216   :  { %v1322_v1 = vadd.f32 %v1321_v48, %v1189_v35 }
 0x217   :  { %v2664_v45 = vpop.f32.mrf.mxu0 }
 0x218   :  { %v1423_v60 = vadd.f32 %v2664_v45, %v1316_v20 }
 0x219   :  { %v1415_v47 = vpop.f32.mrf.mxu0 }
 0x21a   :  { %v1416_v42 = vadd.f32 %v1415_v47, %v1310_v31 }
 0x21d   :  { %v2667_v50 = vpop.f32.mrf.mxu0 }
 0x21e   :  { %v1437_v8 = vadd.f32 %v2667_v50, %v1328_v25 }
 0x21f   :  { %v1429_v5 = vpop.f32.mrf.mxu0 }
 0x220   :  { %v1430_v9 = vadd.f32 %v1429_v5, %v1322_v1 }
 0x221   :  { %v2686_v51 = vpop.f32.mrf.mxu1 }
 0x222   :  { %v1526_v55 = vadd.f32 %v2686_v51, %v1423_v60 }
 0x223   :  { %v1517_v23 = vpop.f32.mrf.mxu1 }
 0x224   :  { %v1518_v30 = vadd.f32 %v1517_v23, %v1416_v42 }
 0x227   :  { %v2689_v57 = vpop.f32.mrf.mxu1 }
 0x228   :  { %v1542_v19 = vadd.f32 %v2689_v57, %v1437_v8 }
 0x229   :  { %v1533_v0 = vpop.f32.mrf.mxu1 }
 0x22a   :  { %v1534_v14 = vadd.f32 %v1533_v0, %v1430_v9 }
 0x22b   :  { %v2708_v53 = vpop.f32.mrf.mxu0 }
 0x22c   :  { %v1643_v7 = vadd.f32 %v2708_v53, %v1526_v55 }
 0x22d   :  { %v1636_v59 = vpop.f32.mrf.mxu0 }
 0x22e   :  { %v1637_v2 = vadd.f32 %v1636_v59, %v1518_v30 }
 0x22f   :  { %v2711_v6 = vpop.f32.mrf.mxu0 }
 0x230   :  { %v1655_v4 = vadd.f32 %v2711_v6, %v1542_v19 }
 0x231   :  { %v1648_v13 = vpop.f32.mrf.mxu0 }
 0x232   :  { %v1649_v10 = vadd.f32 %v1648_v13, %v1534_v14 }
 0x234   :  { %v2730_v40 = vpop.f32.mrf.mxu1 }
 0x235   :  { %v3482_v12 = vadd.f32 %v2730_v40, %v1643_v7 }
 0x236   :  { %v1733_v49 = vpop.f32.mrf.mxu1 }
 0x237   :  { %v1756_v58 = vmul.f32 0.70710677, %v3482_v12  ;;  %v3485_v63 = vadd.f32 %v1733_v49, %v1637_v2  ;;  %v1851_v49 = vld [vmem:[%s3576_s5] sm:$0xf]  ;;  %vm1836_vm12 = vcmp.ge.f32.partialorder %v3482_v12, 0.0  ;;  %s2879_s5 = smov [#allocation2]  }
 0x238   :  { %v2733_v17 = vpop.f32.mrf.mxu1  ;;  %s2354_s25 = sshll.u32 %s2879_s5, 4  ;;  %s2355_s25 = int_to_ptr.vmem [resolvable:$true] %s2354_s25 }
 0x239   :  { %v1760_v18 = vand.u32 2147483647, %v1756_v58  ;;  %v1755_v3 = vmul.f32 0.70710677, %v3485_v63  ;;  %v3488_v21 = vadd.f32 %v2733_v17, %v1655_v4  ;;  %vm1835_vm13 = vcmp.ge.f32.partialorder %v3485_v63, 0.0  ;;  %s2854_s1 = scalar_lea.vmem %s2355_s25, 64  ;;  %p2859_p1 = scmp.lt.s32.totalorder %s2355_s25, %s2355_s25 }
 0x23a   :  { %v1745_v22 = vpop.f32.mrf.mxu1  ;;  %p2855_p0 = scmp.ne.s32.totalorder %s2355_s25, %s2854_s1  ;;  %p2860_p2 = scmp.lt.s32.totalorder %s2854_s1, %s2854_s1 }
 0x23b   :  { %v1764_v26 = vmul.f32 0.3275911, %v1760_v18  ;;  %v1759_v28 = vand.u32 2147483647, %v1755_v3  ;;  %v3490_v29 = vadd.f32 %v1745_v22, %v1649_v10  ;;  %v1758_v62 = vmul.f32 0.70710677, %v3488_v21 }
 0x23c   :  { %v1812_v38 = vmul.f32 %v1760_v18, %v1760_v18  ;;  %vm1838_vm14 = vcmp.ge.f32.partialorder %v3488_v21, 0.0  ;;  %p2861_p3 = por %p2860_p2, %p2859_p1 }
 0x23d   :  { %v1768_v44 = vadd.f32 1.0, %v1764_v26  ;;  %v1763_v41 = vmul.f32 0.3275911, %v1759_v28  ;;  %v1762_v32 = vand.u32 2147483647, %v1758_v62  ;;  %v1811_v45 = vmul.f32 %v1759_v28, %v1759_v28 }
 0x23e   :  { %v1757_v43 = vmul.f32 0.70710677, %v3490_v29  ;;  %v1816_v46 = vsub.f32 0.0, %v1812_v38  ;;  %v1860_v28 = vsel %vm1858_vm11, %v1851_v49, 0  ;;  %vm1837_vm15 = vcmp.ge.f32.partialorder %v3490_v29, 0.0  ;;  %p2862_p4 = pnand %p2861_p3, %p2855_p0 }
 0x23f   :  { %2838 = vrcp.f32 %v1768_v44  ;;  %v1767_v37 = vadd.f32 1.0, %v1763_v41  ;;  %v1766_v15 = vmul.f32 0.3275911, %v1762_v32  ;;  %v1814_v47 = vmul.f32 %v1762_v32, %v1762_v32 }
 0x240   :  { %v1761_v16 = vand.u32 2147483647, %v1757_v43  ;;  %v1815_v48 = vsub.f32 0.0, %v1811_v45  ;;  %v1821_v39 = vmul.f32 1.442695, %v1816_v46 }
 0x241   :  { %2840 = vrcp.f32 %v1767_v37  ;;  %v1770_v24 = vadd.f32 1.0, %v1766_v15  ;;  %v1818_v5 = vsub.f32 0.0, %v1814_v47 }
 0x242   :  { %v1765_v56 = vmul.f32 0.3275911, %v1761_v16  ;;  %v1813_v51 = vmul.f32 %v1761_v16, %v1761_v16  ;;  %v1819_v53 = vmul.f32 1.442695, %v1815_v48  ;;  %v3497_v16 = vand.u32 4294901760, %v1860_v28 }
 0x243   :  { %2842 = vrcp.f32 %v1770_v24  ;;  %v1825_v31 = vmul.f32 1.442695, %v1818_v5  ;;  %v1832_v24 = vmul.f32 0.5, %v3482_v12 }
 0x244   :  { %v1769_v27 = vadd.f32 1.0, %v1765_v56  ;;  %v1817_v20 = vsub.f32 0.0, %v1813_v51  ;;  %v3504_v51 = vsub.f32 %v1860_v28, %v3497_v16 }
 0x246   :  { %2844 = vrcp.f32 %v1769_v27  ;;  %v1823_v0 = vmul.f32 1.442695, %v1817_v20 }
 0x247   :  { %2846 = vpow2.f32 %v1821_v39 }
 0x248   :  { %2848 = vpow2.f32 %v1819_v53 }
 0x249   :  { %2850 = vpow2.f32 %v1825_v31 }
 0x24a   :  { %2852 = vpow2.f32 %v1823_v0 }
 0x24c   :  { %v2839_v36 = vpop.eup %2838 }
 0x24d   :  { %v1776_v50 = vmul.f32 1.0614054, %v2839_v36 }
 0x24e   :  { %v2841_v52 = vpop.eup %2840 }
 0x24f   :  { %v1780_v23 = vadd.f32 -1.4531521, %v1776_v50  ;;  %v1775_v33 = vmul.f32 1.0614054, %v2841_v52  ;;  %v1831_v50 = vmul.f32 0.5, %v3485_v63  ;;  %v1933_v63 = vand.u32 4294901760, %v3504_v51 }
 0x250   :  { %v2843_v34 = vpop.eup %2842 }
 0x251   :  { %v1784_v54 = vmul.f32 %v2839_v36, %v1780_v23  ;;  %v1779_v57 = vadd.f32 -1.4531521, %v1775_v33  ;;  %v1778_v59 = vmul.f32 1.0614054, %v2843_v34  ;;  %v1834_v33 = vmul.f32 0.5, %v3488_v21 }
 0x253   :  { %v1788_v60 = vadd.f32 1.4214138, %v1784_v54  ;;  %v2845_v61 = vpop.eup %2844  ;;  %v1783_v35 = vmul.f32 %v2841_v52, %v1779_v57  ;;  %v1782_v42 = vadd.f32 -1.4531521, %v1778_v59  ;;  %v1833_v59 = vmul.f32 0.5, %v3490_v29 }
 0x254   :  { %v1777_v25 = vmul.f32 1.0614054, %v2845_v61  ;;  %v2847_v3 = vpop.eup %2846 }
 0x255   :  { %v1792_v55 = vmul.f32 %v2839_v36, %v1788_v60  ;;  %v1787_v6 = vadd.f32 1.4214138, %v1783_v35  ;;  %v1786_v1 = vmul.f32 %v2843_v34, %v1782_v42  ;;  %v2849_v43 = vpop.eup %2848  ;;  %v1934_v42 = vsub.f32 %v3504_v51, %v1933_v63 }
 0x256   :  { %v1781_v7 = vadd.f32 -1.4531521, %v1777_v25  ;;  %v2851_v38 = vpop.eup %2850 }
 0x257   :  { %v1796_v30 = vadd.f32 -0.28449672, %v1792_v55  ;;  %v1791_v8 = vmul.f32 %v2841_v52, %v1787_v6  ;;  %v1790_v40 = vadd.f32 1.4214138, %v1786_v1  ;;  %v2853_v5 = vpop.eup %2852 }
 0x258   :  { %v1785_v2 = vmul.f32 %v2845_v61, %v1781_v7 }
 0x259   :  { %v1800_v9 = vmul.f32 %v2839_v36, %v1796_v30  ;;  %v1795_v19 = vadd.f32 -0.28449672, %v1791_v8  ;;  %v1794_v13 = vmul.f32 %v2843_v34, %v1790_v40  ;;  %v1935_v30 = vand.u32 4294901760, %v1934_v42 }
 0x25a   :  { %v1789_v58 = vadd.f32 1.4214138, %v1785_v2 }
 0x25b   :  { %v1804_v14 = vadd.f32 0.2548296, %v1800_v9  ;;  %v1799_v4 = vmul.f32 %v2841_v52, %v1795_v19  ;;  %v1798_v17 = vadd.f32 -0.28449672, %v1794_v13 }
 0x25c   :  { %v1793_v18 = vmul.f32 %v2845_v61, %v1789_v58 }
 0x25d   :  { %v1808_v10 = vmul.f32 %v2839_v36, %v1804_v14  ;;  %v1803_v22 = vadd.f32 0.2548296, %v1799_v4  ;;  %v1802_v26 = vmul.f32 %v2843_v34, %v1798_v17 }
 0x25e   :  { %v1797_v44 = vadd.f32 -0.28449672, %v1793_v18 }
 0x25f   :  { %v1828_v62 = vmul.f32 %v2847_v3, %v1808_v10  ;;  %v1807_v41 = vmul.f32 %v2841_v52, %v1803_v22  ;;  %v1806_v32 = vadd.f32 0.2548296, %v1802_v26  ;;  %v1856_v22 = vpop.permute.xlu0 %1855 }
 0x260   :  { %v1801_v15 = vmul.f32 %v2845_v61, %v1797_v44 }
 0x261   :  { %v1840_v37 = vsub.f32 2.0, %v1828_v62  ;;  %v1827_v56 = vmul.f32 %v2849_v43, %v1807_v41  ;;  %v1810_v27 = vmul.f32 %v2843_v34, %v1806_v32 }
 0x262   :  { %v1805_v46 = vadd.f32 0.2548296, %v1801_v15 }
 0x263   :  { %v1844_v45 = vsel %vm1836_vm12, %v1840_v37, %v1828_v62  ;;  %v1839_v36 = vsub.f32 2.0, %v1827_v56  ;;  %v1830_v48 = vmul.f32 %v2851_v38, %v1810_v27 }
 0x264   :  { %v1848_v47 = vmul.f32 %v1844_v45, %v1832_v24  ;;  %v1809_v39 = vmul.f32 %v2845_v61, %v1805_v46 }
 0x265   :  { %v1843_v52 = vsel %vm1835_vm13, %v1839_v36, %v1827_v56  ;;  %v1842_v23 = vsub.f32 2.0, %v1830_v48 }
 0x266   :  { %v1847_v12 = vmul.f32 %v1843_v52, %v1831_v50  ;;  %v1829_v53 = vmul.f32 %v2853_v5, %v1809_v39  ;;  %v3508_v54 = vand.u32 4294901760, %v1848_v47 }
 0x267   :  { %v1846_v34 = vsel %vm1838_vm14, %v1842_v23, %v1830_v48 }
 0x268   :  { %v1850_v20 = vmul.f32 %v1846_v34, %v1834_v33  ;;  %v1841_v57 = vsub.f32 2.0, %v1829_v53  ;;  %v3513_v31 = vand.u32 4294901760, %v1847_v12  ;;  %v1981_v21 = vsub.f32 %v1848_v47, %v3508_v54 }
 0x26a   :  { %v1845_v60 = vsel %vm1837_vm15, %v1841_v57, %v1829_v53  ;;  %v3515_v61 = vand.u32 4294901760, %v1850_v20  ;;  %v1988_v29 = vsub.f32 %v1847_v12, %v3513_v31  ;;  %v1982_v1 = vand.u32 4294901760, %v1981_v21 }
 0x26b   :  { %v1849_v35 = vmul.f32 %v1845_v60, %v1833_v59 }
 0x26c   :  { %2735 = vmatpush3.msra.mxu0 %v3515_v61  ;;  %v1967_v55 = vsub.f32 %v1850_v20, %v3515_v61  ;;  %v1989_v40 = vand.u32 4294901760, %v1988_v29  ;;  %v1983_v19 = vsub.f32 %v1981_v21, %v1982_v1 }
 0x26d   :  { %2736 = vmatprep.subr.mxu0 %v2877_v11  ;;  %v1890_v25 = vand.u32 4294901760, %v1849_v35 }
 0x26e   :  { %v1968_v0 = vand.u32 4294901760, %v1967_v55  ;;  %v1990_v49 = vsub.f32 %v1988_v29, %v1989_v40  ;;  %v1984_v14 = vand.u32 4294901760, %v1983_v19 }
 0x26f   :  { %2737 = vmatpush3.msra.mxu0 %v1890_v25  ;;  %v1974_v6 = vsub.f32 %v1849_v35, %v1890_v25 }
 0x270   :  { %2738 = vmatprep.subr.mxu0 %v2877_v11  ;;  %v1969_v7 = vsub.f32 %v1967_v55, %v1968_v0  ;;  %v1991_v58 = vand.u32 4294901760, %v1990_v49 }
 0x271   :  { %2739 = vmatpush3.msra.mxu0 %v3508_v54  ;;  %v1975_v8 = vand.u32 4294901760, %v1974_v6 }
 0x272   :  { %2740 = vmatprep.subr.mxu0 %v2877_v11  ;;  %v1970_v9 = vand.u32 4294901760, %v1969_v7 }
 0x273   :  { %2741 = vmatpush3.msra.mxu0 %v3513_v31  ;;  %v1976_v2 = vsub.f32 %v1974_v6, %v1975_v8 }
 0x274   :  { %2743 = vmatmul.mubr.f32.vlgmr.msra.gmra.mxu0 %v1935_v30  ;;  %2756 = vmatprep.subr.mxu0 %v2877_v11 }
 0x275   :  { %2746 = vmatpush3.msra.mxu1 %v1970_v9  ;;  %2757 = vmatpush3.msra.mxu0 %v1967_v55  ;;  %v1977_v13 = vand.u32 4294901760, %v1976_v2 }
 0x276   :  { %2747 = vmatprep.subr.mxu1 %v2877_v11  ;;  %2758 = vmatprep.subr.mxu0 %v2877_v11 }
 0x277   :  { %2748 = vmatpush3.msra.mxu1 %v1977_v13  ;;  %2759 = vmatpush3.msra.mxu0 %v1974_v6 }
 0x278   :  { %2749 = vmatprep.subr.mxu1 %v2877_v11  ;;  %2760 = vmatprep.subr.mxu0 %v2877_v11 }
 0x279   :  { %2750 = vmatpush3.msra.mxu1 %v1984_v14  ;;  %2761 = vmatpush3.msra.mxu0 %v1981_v21 }
 0x27a   :  { %2751 = vmatprep.subr.mxu1 %v2877_v11  ;;  %2762 = vmatprep.subr.mxu0 %v2877_v11 }
 0x27b   :  { %2752 = vmatpush3.msra.mxu1 %v1991_v58  ;;  %2763 = vmatpush3.msra.mxu0 %v1988_v29 }
 0x27c   :  { %2754 = vmatmul.mubr.f32.vlgmr.msra.gmra.mxu1 %v3497_v16  ;;  %2764 = vmatprep.mubr.msk.f32.mxu0 %vm2878_vm10, %v2877_v11 }
 0x27d   :  { %2767 = vmatprep.subr.mxu1 %v2877_v11  ;;  %2778 = vmatprep.subr.mxu0 %v2877_v11 }
 0x27e   :  { %2765 = vmatmul.mubr.f32.vlgmr.msra.gmra.mxu0 %v3504_v51  ;;  %2768 = vmatpush3.msra.mxu1 %v3515_v61 }
 0x27f   :  { %2779 = vmatpush3.msra.mxu0 %v1968_v0  ;;  %2769 = vmatprep.subr.mxu1 %v2877_v11 }
 0x280   :  { %2780 = vmatprep.subr.mxu0 %v2877_v11  ;;  %2770 = vmatpush3.msra.mxu1 %v1890_v25 }
 0x281   :  { %2781 = vmatpush3.msra.mxu0 %v1975_v8  ;;  %2771 = vmatprep.subr.mxu1 %v2877_v11 }
 0x282   :  { %2782 = vmatprep.subr.mxu0 %v2877_v11  ;;  %2772 = vmatpush3.msra.mxu1 %v3508_v54 }
 0x283   :  { %2783 = vmatpush3.msra.mxu0 %v1982_v1  ;;  %2773 = vmatprep.subr.mxu1 %v2877_v11 }
 0x284   :  { %2784 = vmatprep.subr.mxu0 %v2877_v11  ;;  %2774 = vmatpush3.msra.mxu1 %v3513_v31 }
 0x285   :  { %2775 = vmatprep.mubr.msk.f32.mxu1 %vm2878_vm10, %v2877_v11  ;;  %2785 = vmatpush3.msra.mxu0 %v1989_v40 }
 0x286   :  { %2776 = vmatmul.mubr.f32.vlgmr.msra.gmra.mxu1 %v1933_v63  ;;  %2789 = vmatprep.subr.mxu1 %v2877_v11 }
 0x287   :  { %2786 = vmatprep.mubr.msk.f32.mxu0 %vm2878_vm10, %v2877_v11  ;;  %2790 = vmatpush3.msra.mxu1 %v3515_v61 }
 0x288   :  { %2787 = vmatmul.mubr.f32.vlgmr.msra.gmra.mxu0 %v3497_v16  ;;  %2791 = vmatprep.subr.mxu1 %v2877_v11 }
 0x289   :  { %2792 = vmatpush3.msra.mxu1 %v1890_v25  ;;  %2797 = vmatprep.mubr.msk.f32.mxu1 %vm2878_vm10, %v2877_v11 }
 0x28a   :  { %2793 = vmatprep.subr.mxu1 %v2877_v11 }
 0x28b   :  { %2794 = vmatpush3.msra.mxu1 %v3508_v54 }
 0x28c   :  { %2795 = vmatprep.subr.mxu1 %v2877_v11 }
 0x28d   :  { %2796 = vmatpush3.msra.mxu1 %v3513_v31 }
 0x28e   :  { %2798 = vmatmul.mubr.f32.vlgmr.msra.gmra.mxu1 %v3497_v16 }
 0x334   :  { %v1937_v4 = vpop.f32.mrf.mxu0 }
 0x335   :  { %v1938_v28 = vadd.f32 %v1937_v4, %v1856_v22 }
 0x336   :  { %v2744_v17 = vpop.f32.mrf.mxu0 }
 0x33c   :  { %v2028_v10 = vpop.f32.mrf.mxu1 }
 0x33d   :  { %v2029_v62 = vadd.f32 %v2028_v10, %v1938_v28 }
 0x33e   :  { %v2755_v18 = vpop.f32.mrf.mxu1  ;;  %v2108_v3 = vpop.f32.mrf.mxu0 }
 0x33f   :  { %v2109_v41 = vadd.f32 %v2108_v3, %v2029_v62 }
 0x340   :  { %v2766_v26 = vpop.f32.mrf.mxu0 }
 0x346   :  { %v2185_v44 = vpop.f32.mrf.mxu1 }
 0x347   :  { %v2186_v37 = vadd.f32 %v2185_v44, %v2109_v41 }
 0x348   :  { %v2777_v32 = vpop.f32.mrf.mxu1  ;;  %v2268_v43 = vpop.f32.mrf.mxu0 }
 0x349   :  { %v2269_v11 = vadd.f32 %v2268_v43, %v2186_v37 }
 0x34a   :  { %v2788_v15 = vpop.f32.mrf.mxu0 }
 0x34e   :  { %v2343_v24 = vpop.f32.mrf.mxu1 }
 0x34f   :  { %v2344_v16 = vadd.f32 %v2343_v24, %v2269_v11 }
 0x350   :  { %v2799_v56 = vpop.f32.mrf.mxu1 }
 0x351   :  { %2347 = vst [vmem:[#allocation2] sm:$0xf] %v2344_v16 }
 0x352   :  { %2865 = shalt.err (!%p2862_p4)
}
 0x353   :  { %2357 = dma.vmem_to_hbm [thread:$0]  %s2355_s25, 64, %s3578_s7, [#allocation3]  }
 0x354   :  { %2874 = dma.done.wait [#allocation3], 64  }
 0x355   :  { %2875 = vsyncadd [#allocation3], 4294967232 }
 0x356   :  { %2361 = vsyncpa [#allocation3], 1 }

</bundles_post_ra>
